<compile_context>
chip_gen: v5e
topology: v5e:2x2
jax: 0.10.0
libtpu: 0.0.40
codegen_flags: <defaults>
</compile_context>

<pallas_src>
import jax
import jax.numpy as jnp
from jax.experimental import pallas as pl
from jax.experimental.pallas import tpu as pltpu


def _round_up(x, m):
    return (x + m - 1) // m * m


def _make_kernel(Bc, Tp, T, Dp, Cg, CB, Ncols, widths, tap_off, dense):
    """Fused conv(+bias)+relu+max-over-time+concat kernel for one batch block."""
    BT = Bc * Tp

    def kernel(x_ref, w_ref, b_ref, o_ref):
        xm = x_ref[...]                                      # (Bc*Tp, Dp), bf16
        if dense:
            # One narrow MXU matmul: all taps of all widths packed densely
            # (Co lanes per tap) along N.
            u_all = jnp.dot(xm, w_ref[...], preferred_element_type=jnp.float32)

        for wi, w in enumerate(widths):
            Tv = T - w + 1                                   # valid conv length
            if dense:
                src = u_all                                  # (BT, Ncols) f32
                base = tap_off[wi] * Cg
            else:
                # Per-width split of the matmul along N: result is consumed
                # immediately, never round-tripped through a big scratch.
                c0 = tap_off[wi] * Cg                        # lane-aligned
                src = jnp.dot(xm, w_ref[:, c0:c0 + w * Cg],
                              preferred_element_type=jnp.float32)
                base = 0

            acc = None
            for k in range(w):
                off = base + k * Cg
                if dense:
                    # Bring tap k's Co lanes to lane 0 with an XLU lane roll.
                    tap = src if off == 0 else pltpu.roll(
                        src, shift=Ncols - off, axis=1)
                    tap = tap[:, :CB]                        # aligned 128-lane slice
                else:
                    tap = src[:, off:off + CB]               # lane-aligned slice
                if k:
                    # Temporal shift: row r picks up row r+k (cyclic; invalid
                    # rows are masked below).  Sublane roll = XLU, stays aligned.
                    tap = pltpu.roll(tap, shift=BT - k, axis=0)
                acc = tap if acc is None else acc + tap

            acc3 = acc.reshape(Bc, Tp, CB)
            # Mask rows past the valid conv range (wrapped / partial sums) to
            # -inf BEFORE the max.
            t_idx = jax.lax.broadcasted_iota(jnp.int32, (Bc, Tp, CB), 1)
            acc3 = jnp.where(t_idx < Tv, acc3, jnp.float32(-jnp.inf))
            # Max over time first, then bias + ReLU on the reduced tile
            # (exact: bias is time-invariant, ReLU monotone).
            m = jnp.max(acc3, axis=1)                        # (Bc, CB)
            z = jnp.maximum(m + b_ref[:, wi * CB:(wi + 1) * CB], 0.0)
            o_ref[:, wi * CB:(wi + 1) * CB] = z.astype(o_ref.dtype)

    return kernel


def cnn_text_forward(x, conv_weights, conv_biases, *, widths=(3, 4, 5),
                     compute_dtype=jnp.bfloat16):
    """CNN_Text forward.

    x:               (B, T, D) float32 token-embedding matrix.
    conv_weights[i]: (Co, widths[i], D)  (== PyTorch Conv2d weight squeezed on Ci=1)
    conv_biases[i]:  (Co,)
    returns:         (B, len(widths) * Co) float32, torch.cat order.
    """
    B, T, D = x.shape
    Co = conv_weights[0].shape[0]
    widths = tuple(int(w) for w in widths)
    nw = len(widths)
    if T < max(widths):
        raise ValueError("sequence length T must be >= max(widths)")

    Ktot = sum(widths)
    tap_off, off = [], 0
    for w in widths:
        tap_off.append(off)
        off += w

    # Lane packing of the filter taps along the matmul N axis.
    #  dense (Co <= 64): tap stride Cg = Co (no per-tap 128 padding) -> the
    #  matmul output is ~Ktot*Co lanes wide; taps extracted with lane rolls.
    #  otherwise: tap stride Cg = round_up(Co, 128) -> every tap lane-aligned.
    dense = Co <= 64
    Cg = Co if dense else _round_up(Co, 128)
    CB = 128 if dense else Cg                    # per-width output lane block
    Ncols = _round_up(Ktot * Cg, 128)

    Tp = _round_up(T, 8)
    Dp = _round_up(D, 128)
    cbytes = jnp.dtype(compute_dtype).itemsize

    def vmem_est(bc):
        x_blk = bc * Tp * Dp * cbytes
        w_blk = Dp * Ncols * cbytes
        b_blk = nw * CB * 4
        o_blk = bc * nw * CB * 4
        tmp = bc * Tp * max(Ncols if dense else max(widths) * CB, CB) * 4
        return 2 * (x_blk + w_blk + b_blk + o_blk) + 4 * tmp

    # Batch block: grow toward M = Bc*Tp ~ 512 matmul rows (fills the 256-row
    # MXU on v6e/v7x, amortizes per-step overhead), but keep >= 2 grid steps
    # for big batches (v7x: 2 TensorCores) and stay well under v7x's 64 MiB.
    Bc = 8
    while Bc * Tp < 512 and Bc < _round_up(B, 8) and vmem_est(2 * Bc) <= 28 * 2**20:
        Bc *= 2
    while Bc > 8 and _round_up(B, Bc) // Bc < 2 and B > 8:
        Bc //= 2
    while Bc > 8 and vmem_est(Bc) > 28 * 2**20:
        Bc //= 2
    Bp = _round_up(B, Bc)

    # Cast to compute dtype BEFORE padding (halves padded-x HBM bytes for bf16).
    x_p = jnp.zeros((Bp, Tp, Dp), compute_dtype).at[:B, :T, :D].set(
        x.astype(compute_dtype))
    x_flat = x_p.reshape(Bp * Tp, Dp)

    # Pack every (width, tap) filter slice W_w[:, k, :]^T at lane offset
    # (tap_off[w] + k) * Cg; biases (f32) at lane offset wi * CB.
    w_cat = jnp.zeros((Dp, Ncols), compute_dtype)
    b_cat = jnp.zeros((1, nw * CB), jnp.float32)
    for wi, w in enumerate(widths):
        W = conv_weights[wi].astype(compute_dtype)           # (Co, w, D)
        for k in range(w):
            c0 = (tap_off[wi] + k) * Cg
            w_cat = w_cat.at[:D, c0:c0 + Co].set(W[:, k, :].T)
        b_cat = b_cat.at[0, wi * CB:wi * CB + Co].set(
            conv_biases[wi].astype(jnp.float32))

    kernel = _make_kernel(Bc, Tp, T, Dp, Cg, CB, Ncols, widths, tap_off, dense)
    out_p = pl.pallas_call(
        kernel,
        out_shape=jax.ShapeDtypeStruct((Bp, nw * CB), jnp.float32),
        grid=(Bp // Bc,),
        in_specs=[
            pl.BlockSpec((Bc * Tp, Dp), lambda i: (i, 0)),   # x batch block
            pl.BlockSpec((Dp, Ncols), lambda i: (0, 0)),     # packed filters (grid-invariant)
            pl.BlockSpec((1, nw * CB), lambda i: (0, 0)),    # packed biases (grid-invariant)
        ],
        out_specs=pl.BlockSpec((Bc, nw * CB), lambda i: (i, 0)),
        compiler_params=pltpu.CompilerParams(
            dimension_semantics=("parallel",),
            vmem_limit_bytes=40 * 1024 * 1024,               # safe on v7x (64 MiB physical)
        ),
    )(x_flat, w_cat, b_cat)

    # Un-pad: real batch rows and the first Co lanes of each width's block
    # (same ordering as torch.cat([...], 1)).
    feats = [out_p[:B, wi * CB:wi * CB + Co] for wi in range(nw)]
    return jnp.concatenate(feats, axis=1)


# Pure-JAX reference (mirrors the PyTorch forward exactly) for verification.
def cnn_text_ref(x, conv_weights, conv_biases, widths):
    feats = []
    for wi, w in enumerate(widths):
        W = conv_weights[wi]                                  # (Co, w, D)
        Tv = x.shape[1] - w + 1
        cols = jnp.stack([x[:, k:k + Tv, :] for k in range(w)], axis=2)
        y = jnp.einsum("btkd,ckd->btc", cols, W,
                       precision=jax.lax.Precision.HIGHEST) + conv_biases[wi]
        y = jnp.maximum(y, 0.0)
        feats.append(jnp.max(y, axis=1))
    return jnp.concatenate(feats, axis=1)


if __name__ == "__main__":
    # Small shapes consistent with the module: batch=2, seq=16, n_in=32, filters=8.
    B, T, D = 2, 16, 32
    Co = 8
    widths = (3, 4, 5)

    key = jax.random.PRNGKey(0)
    keys = jax.random.split(key, 1 + 2 * len(widths))
    x = jax.random.normal(keys[0], (B, T, D), jnp.float32)
    conv_w, conv_b = [], []
    for i, w in enumerate(widths):
        conv_w.append(0.2 * jax.random.normal(keys[1 + 2 * i], (Co, w, D), jnp.float32))
        conv_b.append(0.1 * jax.random.normal(keys[2 + 2 * i], (Co,), jnp.float32))

    out = cnn_text_forward(x, conv_w, conv_b, widths=widths)
    jax.block_until_ready(out)

    ref = cnn_text_ref(x, conv_w, conv_b, widths)
    assert out.shape == (B, Co * len(widths))
    max_err = float(jnp.max(jnp.abs(out - ref)))
    assert jnp.allclose(out, ref, atol=5e-2, rtol=5e-2), max_err
    print("KERNEL_OK")
</pallas_src>

<mosaic_0001>
module attributes {stable_mosaic.version = 11 : i64} {
  func.func @kernel(%arg0: i32, %arg1: memref<128x128xbf16, #tpu.memory_space<vmem>>, %arg2: memref<128x128xbf16, #tpu.memory_space<vmem>>, %arg3: memref<1x384xf32, #tpu.memory_space<vmem>>, %arg4: memref<8x384xf32, #tpu.memory_space<vmem>>) attributes {dimension_semantics = [#tpu.dimension_semantics<parallel>], iteration_bounds = array<i64: 1>, scalar_prefetch = 0 : i64, scratch_operands = 0 : i64, tpu.core_type = #tpu.core_type<tc>, window_params = [{transform_indices = @transform_0, window_bounds = array<i64: 128, 128>}, {pipeline_mode = #tpu.pipeline_mode<synchronous>, transform_indices = @transform_1, window_bounds = array<i64: 128, 128>}, {pipeline_mode = #tpu.pipeline_mode<synchronous>, transform_indices = @transform_2, window_bounds = array<i64: 1, 384>}, {transform_indices = @transform_3, window_bounds = array<i64: 8, 384>}]} {
    %c0 = arith.constant 0 : index
    %c0_0 = arith.constant 0 : index
    %0 = vector.load %arg1[%c0, %c0_0] : memref<128x128xbf16, #tpu.memory_space<vmem>>, vector<128x128xbf16>
    %c0_1 = arith.constant 0 : index
    %c0_2 = arith.constant 0 : index
    %1 = vector.load %arg2[%c0_1, %c0_2] : memref<128x128xbf16, #tpu.memory_space<vmem>>, vector<128x128xbf16>
    %cst = arith.constant dense<0.000000e+00> : vector<128x128xf32>
    %2 = tpu.matmul %0, %1, %cst {dimension_numbers = #tpu.dot_dimension_numbers<[1], [0], [0], [1], [0, 0, 1, 1], [], []>} : vector<128x128xbf16>, vector<128x128xbf16>, vector<128x128xf32> -> vector<128x128xf32>
    %c120_i32 = arith.constant 120 : i32
    %3 = tpu.dynamic_rotate %2 by %c120_i32 dim 1 : vector<128x128xf32>, i32 -> vector<128x128xf32>
    %c127_i32 = arith.constant 127 : i32
    %4 = tpu.dynamic_rotate %3 by %c127_i32 dim 0 : vector<128x128xf32>, i32 -> vector<128x128xf32>
    %5 = arith.addf %2, %4 : vector<128x128xf32>
    %c112_i32 = arith.constant 112 : i32
    %6 = tpu.dynamic_rotate %2 by %c112_i32 dim 1 : vector<128x128xf32>, i32 -> vector<128x128xf32>
    %c126_i32 = arith.constant 126 : i32
    %7 = tpu.dynamic_rotate %6 by %c126_i32 dim 0 : vector<128x128xf32>, i32 -> vector<128x128xf32>
    %8 = arith.addf %5, %7 : vector<128x128xf32>
    %9 = vector.shape_cast %8 : vector<128x128xf32> to vector<8x16x128xf32>
    %10 = tpu.iota {dimensions = array<i32: 1>} : vector<8x16x128xi32>
    %c14_i32 = arith.constant 14 : i32
    %11 = vector.broadcast %c14_i32 : i32 to vector<8x16x128xi32>
    %12 = arith.cmpi slt, %10, %11 : vector<8x16x128xi32>
    %cst_3 = arith.constant 0xFF800000 : f32
    %13 = vector.broadcast %cst_3 : f32 to vector<8x16x128xf32>
    %14 = arith.select %12, %9, %13 : vector<8x16x128xi1>, vector<8x16x128xf32>
    %cst_4 = arith.constant dense<0xFF800000> : vector<8x128xf32>
    %15 = vector.multi_reduction <maximumf>, %14, %cst_4 [1] : vector<8x16x128xf32> to vector<8x128xf32>
    %c0_5 = arith.constant 0 : index
    %c0_6 = arith.constant 0 : index
    %16 = vector.load %arg3[%c0_5, %c0_6] : memref<1x384xf32, #tpu.memory_space<vmem>>, vector<1x128xf32>
    %17 = vector.broadcast %16 : vector<1x128xf32> to vector<8x128xf32>
    %18 = arith.addf %15, %17 : vector<8x128xf32>
    %cst_7 = arith.constant 0.000000e+00 : f32
    %19 = vector.broadcast %cst_7 : f32 to vector<8x128xf32>
    %20 = arith.maximumf %18, %19 : vector<8x128xf32>
    %c0_8 = arith.constant 0 : index
    %c0_9 = arith.constant 0 : index
    %21 = vector.load %arg4[%c0_8, %c0_9] : memref<8x384xf32, #tpu.memory_space<vmem>>, vector<8x128xf32>
    tpu.vector_store %arg4[%c0_8, %c0_9], %20 {strides = array<i32>} : memref<8x384xf32, #tpu.memory_space<vmem>>, vector<8x128xf32>,
    %c104_i32 = arith.constant 104 : i32
    %22 = tpu.dynamic_rotate %2 by %c104_i32 dim 1 : vector<128x128xf32>, i32 -> vector<128x128xf32>
    %c96_i32 = arith.constant 96 : i32
    %23 = tpu.dynamic_rotate %2 by %c96_i32 dim 1 : vector<128x128xf32>, i32 -> vector<128x128xf32>
    %c127_i32_10 = arith.constant 127 : i32
    %24 = tpu.dynamic_rotate %23 by %c127_i32_10 dim 0 : vector<128x128xf32>, i32 -> vector<128x128xf32>
    %25 = arith.addf %22, %24 : vector<128x128xf32>
    %c88_i32 = arith.constant 88 : i32
    %26 = tpu.dynamic_rotate %2 by %c88_i32 dim 1 : vector<128x128xf32>, i32 -> vector<128x128xf32>
    %c126_i32_11 = arith.constant 126 : i32
    %27 = tpu.dynamic_rotate %26 by %c126_i32_11 dim 0 : vector<128x128xf32>, i32 -> vector<128x128xf32>
    %28 = arith.addf %25, %27 : vector<128x128xf32>
    %c80_i32 = arith.constant 80 : i32
    %29 = tpu.dynamic_rotate %2 by %c80_i32 dim 1 : vector<128x128xf32>, i32 -> vector<128x128xf32>
    %c125_i32 = arith.constant 125 : i32
    %30 = tpu.dynamic_rotate %29 by %c125_i32 dim 0 : vector<128x128xf32>, i32 -> vector<128x128xf32>
    %31 = arith.addf %28, %30 : vector<128x128xf32>
    %32 = vector.shape_cast %31 : vector<128x128xf32> to vector<8x16x128xf32>
    %33 = tpu.iota {dimensions = array<i32: 1>} : vector<8x16x128xi32>
    %c13_i32 = arith.constant 13 : i32
    %34 = vector.broadcast %c13_i32 : i32 to vector<8x16x128xi32>
    %35 = arith.cmpi slt, %33, %34 : vector<8x16x128xi32>
    %cst_12 = arith.constant 0xFF800000 : f32
    %36 = vector.broadcast %cst_12 : f32 to vector<8x16x128xf32>
    %37 = arith.select %35, %32, %36 : vector<8x16x128xi1>, vector<8x16x128xf32>
    %cst_13 = arith.constant dense<0xFF800000> : vector<8x128xf32>
    %38 = vector.multi_reduction <maximumf>, %37, %cst_13 [1] : vector<8x16x128xf32> to vector<8x128xf32>
    %c0_14 = arith.constant 0 : index
    %c128 = arith.constant 128 : index
    %39 = vector.load %arg3[%c0_14, %c128] : memref<1x384xf32, #tpu.memory_space<vmem>>, vector<1x128xf32>
    %40 = vector.broadcast %39 : vector<1x128xf32> to vector<8x128xf32>
    %41 = arith.addf %38, %40 : vector<8x128xf32>
    %cst_15 = arith.constant 0.000000e+00 : f32
    %42 = vector.broadcast %cst_15 : f32 to vector<8x128xf32>
    %43 = arith.maximumf %41, %42 : vector<8x128xf32>
    %c0_16 = arith.constant 0 : index
    %c128_17 = arith.constant 128 : index
    %44 = vector.load %arg4[%c0_16, %c128_17] : memref<8x384xf32, #tpu.memory_space<vmem>>, vector<8x128xf32>
    tpu.vector_store %arg4[%c0_16, %c128_17], %43 {strides = array<i32>} : memref<8x384xf32, #tpu.memory_space<vmem>>, vector<8x128xf32>,
    %c72_i32 = arith.constant 72 : i32
    %45 = tpu.dynamic_rotate %2 by %c72_i32 dim 1 : vector<128x128xf32>, i32 -> vector<128x128xf32>
    %c64_i32 = arith.constant 64 : i32
    %46 = tpu.dynamic_rotate %2 by %c64_i32 dim 1 : vector<128x128xf32>, i32 -> vector<128x128xf32>
    %c127_i32_18 = arith.constant 127 : i32
    %47 = tpu.dynamic_rotate %46 by %c127_i32_18 dim 0 : vector<128x128xf32>, i32 -> vector<128x128xf32>
    %48 = arith.addf %45, %47 : vector<128x128xf32>
    %c56_i32 = arith.constant 56 : i32
    %49 = tpu.dynamic_rotate %2 by %c56_i32 dim 1 : vector<128x128xf32>, i32 -> vector<128x128xf32>
    %c126_i32_19 = arith.constant 126 : i32
    %50 = tpu.dynamic_rotate %49 by %c126_i32_19 dim 0 : vector<128x128xf32>, i32 -> vector<128x128xf32>
    %51 = arith.addf %48, %50 : vector<128x128xf32>
    %c48_i32 = arith.constant 48 : i32
    %52 = tpu.dynamic_rotate %2 by %c48_i32 dim 1 : vector<128x128xf32>, i32 -> vector<128x128xf32>
    %c125_i32_20 = arith.constant 125 : i32
    %53 = tpu.dynamic_rotate %52 by %c125_i32_20 dim 0 : vector<128x128xf32>, i32 -> vector<128x128xf32>
    %54 = arith.addf %51, %53 : vector<128x128xf32>
    %c40_i32 = arith.constant 40 : i32
    %55 = tpu.dynamic_rotate %2 by %c40_i32 dim 1 : vector<128x128xf32>, i32 -> vector<128x128xf32>
    %c124_i32 = arith.constant 124 : i32
    %56 = tpu.dynamic_rotate %55 by %c124_i32 dim 0 : vector<128x128xf32>, i32 -> vector<128x128xf32>
    %57 = arith.addf %54, %56 : vector<128x128xf32>
    %58 = vector.shape_cast %57 : vector<128x128xf32> to vector<8x16x128xf32>
    %59 = tpu.iota {dimensions = array<i32: 1>} : vector<8x16x128xi32>
    %c12_i32 = arith.constant 12 : i32
    %60 = vector.broadcast %c12_i32 : i32 to vector<8x16x128xi32>
    %61 = arith.cmpi slt, %59, %60 : vector<8x16x128xi32>
    %cst_21 = arith.constant 0xFF800000 : f32
    %62 = vector.broadcast %cst_21 : f32 to vector<8x16x128xf32>
    %63 = arith.select %61, %58, %62 : vector<8x16x128xi1>, vector<8x16x128xf32>
    %cst_22 = arith.constant dense<0xFF800000> : vector<8x128xf32>
    %64 = vector.multi_reduction <maximumf>, %63, %cst_22 [1] : vector<8x16x128xf32> to vector<8x128xf32>
    %c0_23 = arith.constant 0 : index
    %c256 = arith.constant 256 : index
    %65 = vector.load %arg3[%c0_23, %c256] : memref<1x384xf32, #tpu.memory_space<vmem>>, vector<1x128xf32>
    %66 = vector.broadcast %65 : vector<1x128xf32> to vector<8x128xf32>
    %67 = arith.addf %64, %66 : vector<8x128xf32>
    %cst_24 = arith.constant 0.000000e+00 : f32
    %68 = vector.broadcast %cst_24 : f32 to vector<8x128xf32>
    %69 = arith.maximumf %67, %68 : vector<8x128xf32>
    %c0_25 = arith.constant 0 : index
    %c256_26 = arith.constant 256 : index
    %70 = vector.load %arg4[%c0_25, %c256_26] : memref<8x384xf32, #tpu.memory_space<vmem>>, vector<8x128xf32>
    tpu.vector_store %arg4[%c0_25, %c256_26], %69 {strides = array<i32>} : memref<8x384xf32, #tpu.memory_space<vmem>>, vector<8x128xf32>,
    return
  }
  func.func @transform_0(%arg0: i32) -> (i32, i32) {
    %c0_i32 = arith.constant 0 : i32
    %c0_i32_0 = arith.constant 0 : i32
    return %arg0, %c0_i32 : i32, i32
  }
  func.func @transform_1(%arg0: i32) -> (i32, i32) {
    %c0_i32 = arith.constant 0 : i32
    %c0_i32_0 = arith.constant 0 : i32
    %c0_i32_1 = arith.constant 0 : i32
    return %c0_i32, %c0_i32_0 : i32, i32
  }
  func.func @transform_2(%arg0: i32) -> (i32, i32) {
    %c0_i32 = arith.constant 0 : i32
    %c0_i32_0 = arith.constant 0 : i32
    %c0_i32_1 = arith.constant 0 : i32
    return %c0_i32, %c0_i32_0 : i32, i32
  }
  func.func @transform_3(%arg0: i32) -> (i32, i32) {
    %c0_i32 = arith.constant 0 : i32
    %c0_i32_0 = arith.constant 0 : i32
    return %arg0, %c0_i32 : i32, i32
  }
}

</mosaic_0001>

<bundles_post_ra>
// kernel: tpu_custom_call.1
= control target key start
LH: loop header
LB: loop body
LE: loop exit
PB: predicated region body
PF: predicated region fallthrough
CT: control target
= control target key end

     0   :  { %8 = vsyncpa [#allocation3], 0  ;;  %s3106_s0 = inlined_call_operand.hbm [shape: bf16[128,128], index: 0, kind: input, shape index: {}]   ;;  %s3107_s1 = inlined_call_operand.hbm [shape: bf16[128,128], index: 1, kind: input, shape index: {}]   ;;  %s3108_s2 = inlined_call_operand.hbm [shape: f32[1,384], index: 2, kind: input, shape index: {}]   ;;  %s3109_s3 = inlined_call_operand.hbm [shape: f32[8,384], index: 3, kind: output, shape index: {}]  }
   0x1   :  { %9 = vsyncpa [#allocation6], 0 }
   0x2   :  { %10 = vsyncpa [#allocation4], 0  ;;  %s28_s14 = sshll.u32 %s3107_s1, 4  ;;  %s1632_s15 = smov [#allocation5]   ;;  %s29_s14 = int_to_ptr.hbm [resolvable:$true] %s28_s14 }
   0x3   :  { %s30_s16 = sshll.u32 %s1632_s15, 4  ;;  %s15_s19 = sshll.u32 %s3106_s0, 4  ;;  %s31_s16 = int_to_ptr.vmem [resolvable:$true] %s30_s16  ;;  %s16_s19 = int_to_ptr.hbm [resolvable:$true] %s15_s19 }
   0x4   :  { %s1633_s20 = smov 64   ;;  %s1634_s21 = smov 4  }
   0x5   :  { %36 = dma.hbm_to_vmem [thread:$0]  %s29_s14, 1024, %s31_s16, [#allocation6], %s1633_s20, %s1633_s20, %s1634_s21  }
   0x6   :  { %s1635_s22 = smov [#allocation2]   ;;  %s42_s1 = sshll.u32 %s3108_s2, 4  ;;  %s43_s1 = int_to_ptr.hbm [resolvable:$true] %s42_s1 }
   0x7   :  { %s17_s23 = sshll.u32 %s1635_s22, 4  ;;  %s1636_s26 = smov [#allocation7]   ;;  %s18_s23 = int_to_ptr.vmem [resolvable:$true] %s17_s23 }
   0x8   :  { %23 = dma.hbm_to_vmem [thread:$0]  %s16_s19, 1024, %s18_s23, [#allocation3], %s1633_s20, %s1633_s20, %s1634_s21  }
   0x9   :  { %s44_s27 = sshll.u32 %s1636_s26, 4  ;;  %s45_s27 = int_to_ptr.vmem [resolvable:$true] %s44_s27 }
   0xa   :  { %47 = dma.hbm_to_vmem [thread:$0]  %s43_s1, 48, %s45_s27, [#allocation6]  }
   0xb   :  { %1626 = dma.done.wait [#allocation3], 1024  }
   0xc   :  { %1627 = vsyncadd [#allocation3], 4294966272 }
   0xd   :  { %1628 = dma.done.wait [#allocation6], 1072  }
   0xe   :  { %1629 = vsyncadd [#allocation6], 4294966224  ;;  %v1486_v0 = vld [vmem:[#allocation5 + $0x38] sm:$0xff]  ;;  %v1485_v1 = vld [vmem:[#allocation5 + $0x30] sm:$0xff]  ;;  %s1637_s0 = smov 120   ;;  %s1638_s2 = smov 112   ;;  %v285_v62 = vlaneseq }
   0xf   :  { %188 = vmatpush.bf16.msra.mxu0 %v1486_v0  ;;  %1487 = vmatpush.bf16.msra.mxu1 %v1486_v0  ;;  %v1484_v2 = vld [vmem:[#allocation5 + $0x28] sm:$0xff]  ;;  %v1483_v3 = vld [vmem:[#allocation5 + $0x20] sm:$0xff]  ;;  %v1482_v4 = vld [vmem:[#allocation5 + $0x18] sm:$0xff]  ;;  %s1639_s28 = smov 96   ;;  %s1640_s29 = smov 104   ;;  %vm505_vm3 = vcmask 1041409  }
  0x10   :  { %1489 = vmatpush.bf16.msra.mxu3 %v1486_v0  ;;  %1488 = vmatpush.bf16.msra.mxu2 %v1486_v0  ;;  %v1481_v5 = vld [vmem:[#allocation5 + $0x10] sm:$0xff]  ;;  %v1480_v6 = vld [vmem:[#allocation5 + $0x8] sm:$0xff]  ;;  %v1479_v7 = vld [vmem:[#allocation5] sm:$0xff]  ;;  %s1641_s30 = smov 88   ;;  %s1642_s4 = smov 80   ;;  %vm508_vm4 = vcmask 1042434  }
  0x11   :  { %v1471_v8 = vld [vmem:[#allocation2] sm:$0xff]  ;;  %v1473_v9 = vld [vmem:[#allocation2 + $0x10] sm:$0xff]  ;;  %v1472_v12 = vld [vmem:[#allocation2 + $0x8] sm:$0xff]  ;;  %s1643_s5 = smov 72   ;;  %vm511_vm5 = vcmask 1043459   ;;  %vm514_vm6 = vcmask 1044484  }
  0x12   :  { %v1477_v10 = vld [vmem:[#allocation2 + $0x30] sm:$0xff]  ;;  %v1475_v11 = vld [vmem:[#allocation2 + $0x20] sm:$0xff]  ;;  %v1474_v13 = vld [vmem:[#allocation2 + $0x18] sm:$0xff]  ;;  %vm517_vm7 = vcmask 1045509   ;;  %vm520_vm8 = vcmask 1046534   ;;  %vm523_vm9 = vcmask 1047559  }
  0x13   :  { %189 = vmatpush.bf16.msra.mxu0 %v1485_v1  ;;  %1490 = vmatpush.bf16.msra.mxu1 %v1485_v1  ;;  %v1476_v14 = vld [vmem:[#allocation2 + $0x28] sm:$0xff]  ;;  %v1478_v15 = vld [vmem:[#allocation2 + $0x38] sm:$0xff]  ;;  %s1644_s6 = smov 56   ;;  %s1645_s7 = smov 48  }
  0x14   :  { %1492 = vmatpush.bf16.msra.mxu3 %v1485_v1  ;;  %1491 = vmatpush.bf16.msra.mxu2 %v1485_v1  ;;  %s1646_s8 = smov 40   ;;  %s1647_s9 = smov [#allocation8]  }
  0x15   :  { %s1394_s10 = sshll.u32 %s1647_s9, 4  ;;  %s1396_s13 = sshll.u32 %s3109_s3, 4  ;;  %s1395_s10 = int_to_ptr.vmem [resolvable:$true] %s1394_s10  ;;  %s1397_s13 = int_to_ptr.hbm [resolvable:$true] %s1396_s13 }
  0x17   :  { %190 = vmatpush.bf16.msra.mxu0 %v1484_v2  ;;  %1493 = vmatpush.bf16.msra.mxu1 %v1484_v2 }
  0x18   :  { %1495 = vmatpush.bf16.msra.mxu3 %v1484_v2  ;;  %1494 = vmatpush.bf16.msra.mxu2 %v1484_v2  ;;  %v1923_v2 = vshrl.u32 %v285_v62, 7 }
  0x1a   :  { %vm287_vm0 = vcmp.lt.s32.totalorder %v1923_v2, 7  ;;  %vm368_vm1 = vcmp.lt.s32.totalorder %v1923_v2, 6  ;;  %vm767_vm10 = vcmp.lt.s32.totalorder %v1923_v2, 5  ;;  %vm1238_vm12 = vcmp.lt.s32.totalorder %v1923_v2, 4 }
  0x1b   :  { %191 = vmatpush.bf16.msra.mxu0 %v1483_v3  ;;  %1496 = vmatpush.bf16.msra.mxu1 %v1483_v3 }
  0x1c   :  { %1498 = vmatpush.bf16.msra.mxu3 %v1483_v3  ;;  %1497 = vmatpush.bf16.msra.mxu2 %v1483_v3 }
  0x1f   :  { %192 = vmatpush.bf16.msra.mxu0 %v1482_v4  ;;  %1499 = vmatpush.bf16.msra.mxu1 %v1482_v4 }
  0x20   :  { %1501 = vmatpush.bf16.msra.mxu3 %v1482_v4  ;;  %1500 = vmatpush.bf16.msra.mxu2 %v1482_v4 }
  0x23   :  { %193 = vmatpush.bf16.msra.mxu0 %v1481_v5  ;;  %1502 = vmatpush.bf16.msra.mxu1 %v1481_v5 }
  0x24   :  { %1504 = vmatpush.bf16.msra.mxu3 %v1481_v5  ;;  %1503 = vmatpush.bf16.msra.mxu2 %v1481_v5 }
  0x27   :  { %194 = vmatpush.bf16.msra.mxu0 %v1480_v6  ;;  %1505 = vmatpush.bf16.msra.mxu1 %v1480_v6 }
  0x28   :  { %1507 = vmatpush.bf16.msra.mxu3 %v1480_v6  ;;  %1506 = vmatpush.bf16.msra.mxu2 %v1480_v6 }
  0x2b   :  { %195 = vmatpush.bf16.msra.mxu0 %v1479_v7  ;;  %1508 = vmatpush.bf16.msra.mxu1 %v1479_v7 }
  0x2c   :  { %1510 = vmatpush.bf16.msra.mxu3 %v1479_v7  ;;  %1509 = vmatpush.bf16.msra.mxu2 %v1479_v7 }
  0x2e   :  { %196 = vmatmul.bf16.vlgmr.msra.gmra.mxu0 %v1471_v8  ;;  %206 = vmatmul.bf16.vlgmr.msra.gmra.mxu1 %v1473_v9 }
  0x2f   :  { %226 = vmatmul.bf16.vlgmr.msra.gmra.mxu3 %v1477_v10  ;;  %216 = vmatmul.bf16.vlgmr.msra.gmra.mxu2 %v1475_v11 }
  0x3e   :  { %201 = vmatmul.bf16.gmra.mxu0 %v1472_v12  ;;  %211 = vmatmul.bf16.gmra.mxu1 %v1474_v13 }
  0x3f   :  { %221 = vmatmul.bf16.gmra.mxu2 %v1476_v14  ;;  %231 = vmatmul.bf16.gmra.mxu3 %v1478_v15 }
  0xab   :  { %v1681_v16 = vpop.f32.mrf.mxu0  ;;  %v1683_v17 = vpop.f32.mrf.mxu1 }
  0xac   :  { %245 = vrot.lane.b32.xlu2 %v1683_v17, %s1637_s0  ;;  %320 = vrot.lane.b32.xlu1 %v1681_v16, %s1638_s2 }
  0xad   :  { %237 = vrot.lane.b32.xlu0 %v1681_v16, %s1637_s0 }
  0xb2   :  { %v1703_v18 = vpop.f32.mrf.mxu3  ;;  %v1711_v19 = vpop.f32.mrf.mxu2 }
  0xb3   :  { %v1719_v20 = vpop.f32.mrf.mxu1  ;;  %v1727_v21 = vpop.f32.mrf.mxu0 }
  0xb4   :  { %328 = vrot.lane.b32.xlu2 %v1683_v17, %s1638_s2  ;;  %567 = vrot.lane.b32.xlu1 %v1683_v17, %s1639_s28 }
  0xb5   :  { %535 = vrot.lane.b32.xlu0 %v1683_v17, %s1640_s29 }
  0xba   :  { %v1735_v22 = vpop.f32.mrf.mxu3  ;;  %v1743_v23 = vpop.f32.mrf.mxu2 }
  0xbb   :  { %v1763_v24 = vpop.f32.mrf.mxu0  ;;  %v1773_v26 = vpop.f32.mrf.mxu1 }
  0xbc   :  { %527 = vrot.lane.b32.xlu2 %v1681_v16, %s1640_s29  ;;  %639 = vrot.lane.b32.xlu1 %v1681_v16, %s1641_s30 }
  0xbd   :  { %559 = vrot.lane.b32.xlu0 %v1681_v16, %s1639_s28 }
  0xc2   :  { %v1803_v32 = vpop.f32.mrf.mxu3  ;;  %v1805_v33 = vpop.f32.mrf.mxu2 }
  0xc3   :  { %3154 = vst [vmem:[#allocation15_spill] sm:$0xff] %v1803_v32  ;;  %v1843_v43 = vpop.f32.mrf.mxu0  ;;  %v1857_v47 = vpop.f32.mrf.mxu1 }
  0xc4   :  { %647 = vrot.lane.b32.xlu2 %v1683_v17, %s1641_s30  ;;  %344 = vrot.lane.b32.xlu1 %v1703_v18, %s1638_s2  ;;  %3155 = vst [vmem:[#allocation16_spill] sm:$0xff] %v1805_v33 }
  0xc5   :  { %261 = vrot.lane.b32.xlu0 %v1703_v18, %s1637_s0 }
  0xca   :  { %v1895_v57 = vpop.f32.mrf.mxu2  ;;  %v1897_v58 = vpop.f32.mrf.mxu3 }
  0xcb   :  { %3164 = vst [vmem:[#allocation25_spill] sm:$0xff] %v1897_v58 }
  0xcc   :  { %253 = vrot.lane.b32.xlu2 %v1711_v19, %s1637_s0  ;;  %543 = vrot.lane.b32.xlu1 %v1711_v19, %s1640_s29 }
  0xcd   :  { %336 = vrot.lane.b32.xlu0 %v1711_v19, %s1638_s2 }
  0xd4   :  { %551 = vrot.lane.b32.xlu2 %v1703_v18, %s1640_s29  ;;  %537 = vrot.lane.b32.xlu1 %v1719_v20, %s1640_s29 }
  0xd5   :  { %583 = vrot.lane.b32.xlu0 %v1703_v18, %s1639_s28 }
  0xdc   :  { %575 = vrot.lane.b32.xlu2 %v1711_v19, %s1639_s28  ;;  %561 = vrot.lane.b32.xlu1 %v1727_v21, %s1639_s28 }
  0xdd   :  { %655 = vrot.lane.b32.xlu0 %v1711_v19, %s1641_s30 }
  0xe4   :  { %247 = vrot.lane.b32.xlu2 %v1719_v20, %s1637_s0  ;;  %263 = vrot.lane.b32.xlu1 %v1735_v22, %s1637_s0 }
  0xe5   :  { %239 = vrot.lane.b32.xlu0 %v1727_v21, %s1637_s0 }
  0xec   :  { %338 = vrot.lane.b32.xlu1 %v1743_v23, %s1638_s2  ;;  %322 = vrot.lane.b32.xlu2 %v1727_v21, %s1638_s2 }
  0xed   :  { %330 = vrot.lane.b32.xlu0 %v1719_v20, %s1638_s2 }
  0xf4   :  { %585 = vrot.lane.b32.xlu1 %v1735_v22, %s1639_s28  ;;  %569 = vrot.lane.b32.xlu2 %v1719_v20, %s1639_s28 }
  0xf5   :  { %529 = vrot.lane.b32.xlu0 %v1727_v21, %s1640_s29 }
  0xfc   :  { %657 = vrot.lane.b32.xlu1 %v1743_v23, %s1641_s30  ;;  %641 = vrot.lane.b32.xlu2 %v1727_v21, %s1641_s30 }
  0xfd   :  { %649 = vrot.lane.b32.xlu0 %v1719_v20, %s1641_s30 }
 0x104   :  { %346 = vrot.lane.b32.xlu2 %v1735_v22, %s1638_s2  ;;  %241 = vrot.lane.b32.xlu1 %v1763_v24, %s1637_s0 }
 0x105   :  { %255 = vrot.lane.b32.xlu0 %v1743_v23, %s1637_s0 }
 0x106   :  { %v1771_v25 = vpop.permute.xlu2 %245 }
 0x10c   :  { %545 = vrot.lane.b32.xlu2 %v1743_v23, %s1640_s29  ;;  %332 = vrot.lane.b32.xlu1 %v1773_v26, %s1638_s2 }
 0x10d   :  { %553 = vrot.lane.b32.xlu0 %v1735_v22, %s1640_s29 }
 0x10e   :  { %v1781_v27 = vpop.permute.xlu2 %328 }
 0x114   :  { %539 = vrot.lane.b32.xlu2 %v1773_v26, %s1640_s29  ;;  %531 = vrot.lane.b32.xlu1 %v1763_v24, %s1640_s29 }
 0x115   :  { %577 = vrot.lane.b32.xlu0 %v1743_v23, %s1639_s28 }
 0x116   :  { %v1789_v28 = vpop.permute.xlu2 %527 }
 0x117   :  { %3151 = vst [vmem:[#allocation12_spill] sm:$0xff] %v1789_v28 }
 0x11c   :  { %563 = vrot.lane.b32.xlu2 %v1763_v24, %s1639_s28  ;;  %651 = vrot.lane.b32.xlu1 %v1773_v26, %s1641_s30 }
 0x11d   :  { %249 = vrot.lane.b32.xlu0 %v1773_v26, %s1637_s0 }
 0x11e   :  { %v1797_v29 = vpop.permute.xlu2 %647  ;;  %v1799_v30 = vpop.permute.xlu1 %320 }
 0x11f   :  { %3152 = vst [vmem:[#allocation13_spill] sm:$0xff] %v1797_v29  ;;  %v1801_v31 = vpop.permute.xlu0 %237  ;;  %v3110_v9 = vrot.slane %v1797_v29, 2 }
 0x120   :  { %3153 = vst [vmem:[#allocation14_spill] sm:$0xff] %v1801_v31 }
 0x124   :  { %265 = vrot.lane.b32.xlu2 %v1803_v32, %s1637_s0  ;;  %257 = vrot.lane.b32.xlu1 %v1805_v33, %s1637_s0 }
 0x125   :  { %324 = vrot.lane.b32.xlu0 %v1763_v24, %s1638_s2 }
 0x126   :  { %v1813_v34 = vpop.permute.xlu2 %253  ;;  %v1815_v35 = vpop.permute.xlu1 %567 }
 0x127   :  { %3156 = vst [vmem:[#allocation17_spill] sm:$0xff] %v1815_v35  ;;  %v1817_v36 = vpop.permute.xlu0 %535  ;;  %v3111_v4 = vrot.slane %v1815_v35, 1 }
 0x12c   :  { %340 = vrot.lane.b32.xlu2 %v1805_v33, %s1638_s2  ;;  %555 = vrot.lane.b32.xlu1 %v1803_v32, %s1640_s29 }
 0x12d   :  { %571 = vrot.lane.b32.xlu0 %v1773_v26, %s1639_s28 }
 0x12e   :  { %v1825_v37 = vpop.permute.xlu2 %551  ;;  %v1827_v38 = vpop.permute.xlu1 %639 }
 0x12f   :  { %3157 = vst [vmem:[#allocation18_spill] sm:$0xff] %v1825_v37  ;;  %v1829_v39 = vpop.permute.xlu0 %559 }
 0x130   :  { %3158 = vst [vmem:[#allocation19_spill] sm:$0xff] %v1827_v38 }
 0x131   :  { %3159 = vst [vmem:[#allocation20_spill] sm:$0xff] %v1829_v39 }
 0x134   :  { %587 = vrot.lane.b32.xlu2 %v1803_v32, %s1639_s28  ;;  %579 = vrot.lane.b32.xlu1 %v1805_v33, %s1639_s28 }
 0x135   :  { %643 = vrot.lane.b32.xlu0 %v1763_v24, %s1641_s30 }
 0x136   :  { %v1837_v40 = vpop.permute.xlu2 %575  ;;  %v1839_v41 = vpop.permute.xlu1 %344 }
 0x137   :  { %3160 = vst [vmem:[#allocation21_spill] sm:$0xff] %v1837_v40  ;;  %v1841_v42 = vpop.permute.xlu0 %261 }
 0x13c   :  { %659 = vrot.lane.b32.xlu2 %v1805_v33, %s1641_s30  ;;  %243 = vrot.lane.b32.xlu1 %v1843_v43, %s1637_s0 }
 0x13d   :  { %348 = vrot.lane.b32.xlu0 %v1803_v32, %s1638_s2 }
 0x13e   :  { %v1851_v44 = vpop.permute.xlu2 %247  ;;  %v1853_v45 = vpop.permute.xlu1 %543 }
 0x13f   :  { %v1855_v46 = vpop.permute.xlu0 %336  ;;  %v274_v29 = vrot.slane %v1851_v44, 1 }
 0x144   :  { %334 = vrot.lane.b32.xlu2 %v1857_v47, %s1638_s2  ;;  %251 = vrot.lane.b32.xlu1 %v1857_v47, %s1637_s0 }
 0x145   :  { %547 = vrot.lane.b32.xlu0 %v1805_v33, %s1640_s29 }
 0x146   :  { %v1865_v48 = vpop.permute.xlu1 %537  ;;  %v1867_v49 = vpop.permute.xlu2 %322 }
 0x147   :  { %v1869_v50 = vpop.permute.xlu0 %583 }
 0x148   :  { %3161 = vst [vmem:[#allocation22_spill] sm:$0xff] %v1869_v50 }
 0x14c   :  { %533 = vrot.lane.b32.xlu2 %v1843_v43, %s1640_s29  ;;  %326 = vrot.lane.b32.xlu1 %v1843_v43, %s1638_s2 }
 0x14d   :  { %541 = vrot.lane.b32.xlu0 %v1857_v47, %s1640_s29 }
 0x14e   :  { %v1877_v51 = vpop.permute.xlu1 %561  ;;  %v1879_v52 = vpop.permute.xlu2 %569 }
 0x14f   :  { %3162 = vst [vmem:[#allocation23_spill] sm:$0xff] %v1877_v51  ;;  %v1881_v53 = vpop.permute.xlu0 %655  ;;  %v3112_v3 = vrot.slane %v1879_v52, 1  ;;  %v3132_v35 = vrot.slane %v1877_v51, 1 }
 0x150   :  { %3163 = vst [vmem:[#allocation24_spill] sm:$0xff] %v1881_v53 }
 0x151   :  { %v617_v5 = vsel %vm287_vm0, %v3111_v4, %v3112_v3  ;;  %v3114_v4 = vrot.slane %v1837_v40, 1  ;;  %v353_v40 = vrot.slane %v1867_v49, 2 }
 0x152   :  { %v627_v11 = vadd.f32 %v617_v5, %v1817_v36 }
 0x154   :  { %653 = vrot.lane.b32.xlu2 %v1857_v47, %s1641_s30  ;;  %573 = vrot.lane.b32.xlu1 %v1857_v47, %s1639_s28 }
 0x155   :  { %565 = vrot.lane.b32.xlu0 %v1843_v43, %s1639_s28 }
 0x156   :  { %v1889_v54 = vpop.permute.xlu1 %263  ;;  %v1891_v55 = vpop.permute.xlu2 %641 }
 0x157   :  { %v1893_v56 = vpop.permute.xlu0 %239 }
 0x15c   :  { %259 = vrot.lane.b32.xlu2 %v1895_v57, %s1637_s0  ;;  %645 = vrot.lane.b32.xlu1 %v1843_v43, %s1641_s30 }
 0x15d   :  { %267 = vrot.lane.b32.xlu0 %v1897_v58, %s1637_s0 }
 0x15e   :  { %v1905_v59 = vpop.permute.xlu1 %338  ;;  %v1907_v60 = vpop.permute.xlu2 %346 }
 0x15f   :  { %v1909_v61 = vpop.permute.xlu0 %330 }
 0x164   :  { %557 = vrot.lane.b32.xlu2 %v1897_v58, %s1640_s29  ;;  %350 = vrot.lane.b32.xlu1 %v1897_v58, %s1638_s2 }
 0x165   :  { %342 = vrot.lane.b32.xlu0 %v1895_v57, %s1638_s2 }
 0x166   :  { %v1917_v63 = vpop.permute.xlu1 %585  ;;  %v1919_v0 = vpop.permute.xlu2 %545 }
 0x167   :  { %3165 = vst [vmem:[#allocation26_spill] sm:$0xff] %v1917_v63  ;;  %v1921_v1 = vpop.permute.xlu0 %529 }
 0x16c   :  { %581 = vrot.lane.b32.xlu2 %v1895_v57, %s1639_s28  ;;  %549 = vrot.lane.b32.xlu1 %v1895_v57, %s1640_s29 }
 0x16d   :  { %589 = vrot.lane.b32.xlu0 %v1897_v58, %s1639_s28 }
 0x16e   :  { %v1940_v6 = vpop.permute.xlu1 %657  ;;  %v1942_v7 = vpop.permute.xlu2 %539 }
 0x16f   :  { %3166 = vst [vmem:[#allocation27_spill] sm:$0xff] %v1942_v7  ;;  %v650_v8 = vpop.permute.xlu0 %649  ;;  %v680_v3 = vrot.slane %v1940_v6, 2 }
 0x170   :  { %v676_v10 = vrot.slane %v650_v8, 2 }
 0x172   :  { %v697_v12 = vsel %vm368_vm1, %v3110_v9, %v676_v10 }
 0x173   :  { %v1951_v13 = vadd.f32 %v697_v12, %v627_v11 }
 0x174   :  { %665 = vrot.lane.b32.xlu2 %v1735_v22, %s1641_s30  ;;  %663 = vrot.lane.b32.xlu1 %v1703_v18, %s1641_s30 }
 0x175   :  { %3167 = vst [vmem:[#allocation28_spill] sm:$0xff] %v1951_v13  ;;  %661 = vrot.lane.b32.xlu0 %v1895_v57, %s1641_s30  ;;  %v3115_v13 = vrot.slane %v1881_v53, 2 }
 0x176   :  { %v1959_v14 = vpop.permute.xlu2 %563  ;;  %v1961_v15 = vpop.permute.xlu1 %241 }
 0x177   :  { %v1963_v36 = vpop.permute.xlu0 %255  ;;  %v693_v38 = vsel %vm368_vm1, %v3115_v13, %v680_v3 }
 0x17c   :  { %719 = vrot.lane.b32.xlu2 %v1681_v16, %s1642_s4  ;;  %669 = vrot.lane.b32.xlu1 %v1897_v58, %s1641_s30 }
 0x17d   :  { %667 = vrot.lane.b32.xlu0 %v1803_v32, %s1641_s30 }
 0x17e   :  { %v1971_v62 = vpop.permute.xlu2 %265  ;;  %v1973_v5 = vpop.permute.xlu1 %332 }
 0x17f   :  { %v554_v8 = vpop.permute.xlu0 %553 }
 0x184   :  { %725 = vrot.lane.b32.xlu2 %v1843_v43, %s1642_s4  ;;  %723 = vrot.lane.b32.xlu1 %v1763_v24, %s1642_s4 }
 0x185   :  { %721 = vrot.lane.b32.xlu0 %v1727_v21, %s1642_s4 }
 0x186   :  { %v1981_v11 = vpop.permute.xlu2 %340  ;;  %v1983_v12 = vpop.permute.xlu1 %531 }
 0x187   :  { %3168 = vst [vmem:[#allocation29_spill] sm:$0xff] %v1983_v12  ;;  %v1985_v9 = vpop.permute.xlu0 %577  ;;  %v278_v12 = vrot.slane %v1963_v36, 1 }
 0x188   :  { %v3116_v37 = vrot.slane %v1985_v9, 1 }
 0x18a   :  { %v613_v50 = vsel %vm287_vm0, %v3114_v4, %v3116_v37 }
 0x18b   :  { %v631_v28 = vadd.f32 %v613_v50, %v1853_v45  ;;  %v3121_v45 = vrot.slane %v1917_v63, 1  ;;  %v3172_v63 = vrot.slane %v1973_v5, 2 }
 0x18c   :  { %731 = vrot.lane.b32.xlu2 %v1773_v26, %s1642_s4  ;;  %729 = vrot.lane.b32.xlu1 %v1719_v20, %s1642_s4 }
 0x18d   :  { %727 = vrot.lane.b32.xlu0 %v1683_v17, %s1642_s4  ;;  %v2008_v6 = vadd.f32 %v693_v38, %v631_v28 }
 0x18e   :  { %v2010_v39 = vpop.permute.xlu2 %587  ;;  %v2012_v4 = vpop.permute.xlu1 %651 }
 0x18f   :  { %3169 = vst [vmem:[#allocation30_spill] sm:$0xff] %v2008_v6  ;;  %v2015_v50 = vpop.permute.xlu0 %249  ;;  %v3122_v13 = vrot.slane %v2010_v39, 1  ;;  %v3125_v37 = vrot.slane %v2012_v4, 2  ;;  %v357_v6 = vrot.slane %v1909_v61, 2 }
 0x190   :  { %3170 = vst [vmem:[#allocation31_spill] sm:$0xff] %v2010_v39  ;;  %v3123_v7 = vrot.slane %v2015_v50, 1 }
 0x191   :  { %v608_v28 = vsel %vm287_vm0, %v3121_v45, %v3122_v13  ;;  %v696_v38 = vsel %vm368_vm1, %v676_v10, %v3125_v37  ;;  %v378_v45 = vsel %vm368_vm1, %v357_v6, %v3172_v63 }
 0x192   :  { %v297_v44 = vsel %vm287_vm0, %v274_v29, %v3123_v7  ;;  %v2037_v53 = vadd.f32 %v608_v28, %v554_v8  ;;  %v3176_v7 = vrot.slane %v1879_v52, 1  ;;  %v3178_v52 = vrot.slane %v1961_v15, 1 }
 0x193   :  { %v309_v39 = vadd.f32 %v297_v44, %v1719_v20 }
 0x194   :  { %3171 = vst [vmem:[#allocation32_spill] sm:$0xff] %v2037_v53  ;;  %737 = vrot.lane.b32.xlu2 %v1743_v23, %s1642_s4  ;;  %735 = vrot.lane.b32.xlu1 %v1711_v19, %s1642_s4  ;;  %v3177_v53 = vrot.slane %v1771_v25, 1 }
 0x195   :  { %v390_v61 = vadd.f32 %v378_v45, %v309_v39  ;;  %733 = vrot.lane.b32.xlu0 %v1857_v47, %s1642_s4 }
 0x196   :  { %v2050_v10 = vpop.permute.xlu2 %659  ;;  %v2052_v8 = vpop.permute.xlu1 %257 }
 0x197   :  { %3173 = vst [vmem:[#allocation33_spill] sm:$0xff] %v2050_v10  ;;  %v3124_v28 = vrot.slane %v2050_v10, 2  ;;  %v2055_v44 = vpop.permute.xlu0 %324  ;;  %v270_v10 = vrot.slane %v1893_v56, 1  ;;  %v298_v56 = vsel %vm287_vm0, %v3177_v53, %v274_v29  ;;  %v3179_v29 = vrot.slane %v1801_v31, 1 }
 0x198   :  { %3174 = vst [vmem:[#allocation34_spill] sm:$0xff] %v2052_v8  ;;  %v3181_v53 = vrot.slane %v2052_v8, 1  ;;  %v361_v31 = vrot.slane %v1905_v59, 2  ;;  %v3187_v59 = vrot.slane %v1891_v55, 2 }
 0x199   :  { %v2061_v63 = vsel %vm368_vm1, %v680_v3, %v3124_v28  ;;  %v2077_v3 = vadd.s32 8, %v1923_v2 }
 0x19a   :  { %v293_v36 = vsel %vm287_vm0, %v278_v12, %v3181_v53 }
 0x19b   :  { %vm403_vm2 = vcmp.lt.s32.totalorder %v2077_v3, 14  ;;  %vm801_vm11 = vcmp.lt.s32.totalorder %v2077_v3, 13  ;;  %vm1272_vm13 = vcmp.lt.s32.totalorder %v2077_v3, 12 }
 0x19c   :  { %743 = vrot.lane.b32.xlu2 %v1703_v18, %s1642_s4  ;;  %741 = vrot.lane.b32.xlu1 %v1895_v57, %s1642_s4  ;;  %v409_v37 = vsel %vm403_vm2, %v390_v61, -inf  ;;  %v3185_v61 = vrot.slane %v1985_v9, 1  ;;  %v3140_v9 = vrot.slane %v1799_v30, 2 }
 0x19d   :  { %739 = vrot.lane.b32.xlu0 %v1805_v33, %s1642_s4 }
 0x19e   :  { %v2069_v39 = vpop.permute.xlu2 %334  ;;  %v2071_v45 = vpop.permute.xlu1 %555 }
 0x19f   :  { %3175 = vst [vmem:[#allocation35_spill] sm:$0xff] %v2071_v45  ;;  %v2073_v13 = vpop.permute.xlu0 %571 }
 0x1a0   :  { %v3131_v28 = vrot.slane %v2073_v13, 1 }
 0x1a2   :  { %v616_v33 = vsel %vm287_vm0, %v3176_v7, %v3131_v28  ;;  %v301_v7 = vsel %vm287_vm0, %v270_v10, %v3178_v52  ;;  %v308_v28 = vadd.f32 %v298_v56, %v1683_v17 }
 0x1a3   :  { %v628_v45 = vadd.f32 %v616_v33, %v1865_v48  ;;  %v302_v33 = vsel %vm287_vm0, %v3179_v29, %v270_v10  ;;  %v3180_v48 = vrot.slane %v1781_v27, 2  ;;  %v3183_v10 = vrot.slane %v1959_v14, 1 }
 0x1a4   :  { %749 = vrot.lane.b32.xlu2 %v1897_v58, %s1642_s4  ;;  %747 = vrot.lane.b32.xlu1 %v1803_v32, %s1642_s4  ;;  %v3184_v29 = vrot.slane %v2055_v44, 2  ;;  %v3186_v32 = vrot.slane %v1813_v34, 1 }
 0x1a5   :  { %v379_v49 = vsel %vm368_vm1, %v3180_v48, %v357_v6  ;;  %745 = vrot.lane.b32.xlu0 %v1735_v22, %s1642_s4  ;;  %v2125_v52 = vadd.f32 %v696_v38, %v628_v45  ;;  %v620_v6 = vsel %vm287_vm0, %v3132_v35, %v3183_v10  ;;  %v305_v45 = vadd.f32 %v301_v7, %v1727_v21 }
 0x1a6   :  { %v382_v48 = vsel %vm368_vm1, %v353_v40, %v3184_v29  ;;  %v2139_v53 = vpop.permute.xlu1 %579  ;;  %v2141_v38 = vpop.permute.xlu2 %533  ;;  %v304_v35 = vadd.f32 %v302_v33, %v1681_v16  ;;  %v389_v51 = vadd.f32 %v379_v49, %v308_v28  ;;  %v313_v29 = vadd.f32 %v293_v36, %v1743_v23 }
 0x1a7   :  { %3182 = vst [vmem:[#allocation36_spill] sm:$0xff] %v2125_v52  ;;  %v2147_v52 = vpop.permute.xlu0 %643  ;;  %v3145_v10 = vrot.slane %v2139_v53, 1  ;;  %v624_v7 = vadd.f32 %v620_v6, %v1921_v1  ;;  %v386_v8 = vadd.f32 %v382_v48, %v305_v45  ;;  %v294_v28 = vsel %vm287_vm0, %v3186_v32, %v278_v12 }
 0x1a8   :  { %v3141_v58 = vrot.slane %v2147_v52, 2  ;;  %v434_v33 = vmax.f32 %v389_v51, %v409_v37  ;;  %v3188_v36 = vrot.slane %v1981_v11, 2  ;;  %v383_v51 = vsel %vm368_vm1, %v3140_v9, %v353_v40 }
 0x1a9   :  { %v612_v56 = vsel %vm287_vm0, %v3185_v61, %v3145_v10  ;;  %v405_v12 = vsel %vm403_vm2, %v386_v8, -inf  ;;  %v360_v45 = vrot.slane %v1855_v46, 2 }
 0x1aa   :  { %v700_v1 = vsel %vm368_vm1, %v3187_v59, %v3141_v58  ;;  %v632_v49 = vadd.f32 %v612_v56, %v1919_v0  ;;  %v374_v6 = vsel %vm368_vm1, %v361_v31, %v3188_v36  ;;  %v312_v0 = vadd.f32 %v294_v28, %v1711_v19 }
 0x1ab   :  { %v2177_v48 = vadd.f32 %v700_v1, %v624_v7  ;;  %v394_v32 = vadd.f32 %v374_v6, %v313_v29  ;;  %v385_v56 = vadd.f32 %v383_v51, %v304_v35  ;;  %v435_v29 = vrot.slane %v434_v33, 4 }
 0x1ac   :  { %922 = vrot.lane.b32.xlu2 %v1763_v24, %s1643_s5  ;;  %920 = vrot.lane.b32.xlu1 %v1727_v21, %s1643_s5  ;;  %v2184_v37 = vadd.f32 %v2061_v63, %v632_v49  ;;  %v375_v40 = vsel %vm368_vm1, %v360_v45, %v361_v31  ;;  %v3189_v35 = vrot.slane %v2012_v4, 2  ;;  %v282_v58 = vrot.slane %v1889_v54, 1 }
 0x1ad   :  { %918 = vrot.lane.b32.xlu0 %v1681_v16, %s1643_s5  ;;  %v420_v28 = vmax.f32 %v385_v56, %v405_v12  ;;  %v413_v8 = vsel %vm403_vm2, %v394_v32, -inf  ;;  %v393_v1 = vadd.f32 %v375_v40, %v312_v0  ;;  %v436_v49 = vmax.f32 %v434_v33, %v435_v29 }
 0x1ae   :  { %v2196_v7 = vpop.permute.xlu2 %653  ;;  %v244_v63 = vpop.permute.xlu1 %243  ;;  %v359_v0 = vrot.slane %v2069_v39, 2  ;;  %v3144_v56 = vrot.slane %v1971_v62, 1 }
 0x1af   :  { %v2198_v61 = vpop.permute.xlu0 %348  ;;  %v3142_v59 = vrot.slane %v2196_v7, 2  ;;  %v448_v36 = vmax.f32 %v393_v1, %v413_v8  ;;  %v421_v6 = vrot.slane %v420_v28, 4  ;;  %v437_v31 = vrot.slane %v436_v49, 2 }
 0x1b0   :  { %v272_v40 = vrot.slane %v244_v63, 1  ;;  %v3190_v8 = vrot.slane %v1813_v34, 1  ;;  %v3192_v34 = vrot.slane %v1973_v5, 2  ;;  %v289_v54 = vsel %vm287_vm0, %v282_v58, %v3144_v56 }
 0x1b1   :  { %v2211_v46 = vsel %vm368_vm1, %v3189_v35, %v3142_v59  ;;  %v449_v51 = vrot.slane %v448_v36, 4  ;;  %v422_v29 = vmax.f32 %v420_v28, %v421_v6  ;;  %v3191_v35 = vrot.slane %v2015_v50, 1 }
 0x1b2   :  { %v438_v39 = vmax.f32 %v436_v49, %v437_v31  ;;  %v3143_v59 = vrot.slane %v2198_v61, 2  ;;  %v365_v28 = vrot.slane %v1907_v60, 2  ;;  %v377_v6 = vsel %vm368_vm1, %v3192_v34, %v359_v0 }
 0x1b3   :  { %v450_v63 = vmax.f32 %v448_v36, %v449_v51  ;;  %v423_v49 = vrot.slane %v422_v29, 2  ;;  %v376_v31 = vsel %vm368_vm1, %v359_v0, %v360_v45  ;;  %v3193_v60 = vrot.slane %v1771_v25, 1 }
 0x1b4   :  { %928 = vrot.lane.b32.xlu2 %v1719_v20, %s1643_s5  ;;  %926 = vrot.lane.b32.xlu1 %v1683_v17, %s1643_s5  ;;  %v3194_v36 = vrot.slane %v1961_v15, 1  ;;  %v3146_v45 = vrot.slane %v1839_v41, 2  ;;  %v3147_v0 = vrot.slane %v1841_v42, 1  ;;  %v370_v25 = vsel %vm368_vm1, %v365_v28, %v3143_v59 }
 0x1b5   :  { %924 = vrot.lane.b32.xlu0 %v1843_v43, %s1643_s5  ;;  %v299_v5 = vsel %vm287_vm0, %v272_v40, %v3193_v60 }
 0x1b6   :  { %v2219_v32 = vpop.permute.xlu2 %259  ;;  %v252_v4 = vpop.permute.xlu1 %251  ;;  %v300_v51 = vsel %vm287_vm0, %v3194_v36, %v272_v40  ;;  %v451_v40 = vrot.slane %v450_v63, 2  ;;  %v307_v60 = vadd.f32 %v299_v5, %v1843_v43  ;;  %v290_v59 = vsel %vm287_vm0, %v3147_v0, %v282_v58 }
 0x1b7   :  { %v2222_v12 = vpop.permute.xlu0 %547  ;;  %v276_v33 = vrot.slane %v252_v4, 1  ;;  %v371_v58 = vsel %vm368_vm1, %v3146_v45, %v365_v28  ;;  %v3201_v0 = vrot.slane %v2073_v13, 1 }
 0x1b9   :  { %v295_v1 = vsel %vm287_vm0, %v276_v33, %v3190_v8  ;;  %v296_v9 = vsel %vm287_vm0, %v3191_v35, %v276_v33  ;;  %v439_v8 = vrot.slane %v438_v39, 1  ;;  %v317_v35 = vadd.f32 %v289_v54, %v1735_v22 }
 0x1ba   :  { %v310_v4 = vadd.f32 %v296_v9, %v1773_v26  ;;  %v311_v50 = vadd.f32 %v295_v1, %v1857_v47  ;;  %v3195_v54 = vrot.slane %v1781_v27, 2  ;;  %v452_v27 = vmax.f32 %v450_v63, %v451_v40 }
 0x1bb   :  { %v398_v56 = vadd.f32 %v370_v25, %v317_v35  ;;  %v440_v5 = vmax.f32 %v438_v39, %v439_v8  ;;  %v316_v25 = vadd.f32 %v290_v59, %v1703_v18  ;;  %v3197_v39 = vld [vmem:[#allocation16_spill] sm:$0xff] }
 0x1bc   :  { %v391_v9 = vadd.f32 %v377_v6, %v310_v4  ;;  %934 = vrot.lane.b32.xlu2 %v1711_v19, %s1643_s5  ;;  %932 = vrot.lane.b32.xlu1 %v1857_v47, %s1643_s5  ;;  %v392_v33 = vadd.f32 %v376_v31, %v311_v50  ;;  %v424_v50 = vmax.f32 %v422_v29, %v423_v49  ;;  %v2287_v49 = vld [vmem:[#allocation7] ss:$0 sm:$0xff] }
 0x1bd   :  { %930 = vrot.lane.b32.xlu0 %v1773_v26, %s1643_s5  ;;  %v306_v31 = vadd.f32 %v300_v51, %v1763_v24  ;;  %v397_v28 = vadd.f32 %v371_v58, %v316_v25  ;;  %v482_v59 = vadd.f32 %v2287_v49, %v440_v5  ;;  %v3198_v58 = vrot.slane %v2139_v53, 1  ;;  %v3199_v25 = vld [vmem:[#allocation21_spill] sm:$0xff] }
 0x1be   :  { %v2268_v1 = vpop.permute.xlu2 %557  ;;  %v327_v15 = vpop.permute.xlu1 %326  ;;  %v411_v4 = vsel %vm403_vm2, %v392_v33, -inf  ;;  %v3196_v33 = vrot.slane %v2055_v44, 2  ;;  %v425_v35 = vrot.slane %v424_v50, 1  ;;  %v3204_v53 = vrot.slane %v1959_v14, 1  ;;  %v3208_v14 = vld [vmem:[#allocation24_spill] sm:$0xff] }
 0x1bf   :  { %v542_v34 = vpop.permute.xlu0 %541  ;;  %v355_v6 = vrot.slane %v327_v15, 2  ;;  %v441_v36 = vmax.f32 %v391_v9, %v411_v4 }
 0x1c1   :  { %v380_v10 = vsel %vm368_vm1, %v355_v6, %v3195_v54  ;;  %v381_v29 = vsel %vm368_vm1, %v3196_v33, %v355_v6  ;;  %v442_v9 = vrot.slane %v441_v36, 4 }
 0x1c2   :  { %v387_v51 = vadd.f32 %v381_v29, %v306_v31  ;;  %v388_v15 = vadd.f32 %v380_v10, %v307_v60  ;;  %v417_v10 = vsel %vm403_vm2, %v398_v56, -inf  ;;  %v453_v31 = vrot.slane %v452_v27, 1 }
 0x1c3   :  { %v443_v4 = vmax.f32 %v441_v36, %v442_v9  ;;  %v426_v29 = vmax.f32 %v424_v50, %v425_v35  ;;  %v462_v9 = vmax.f32 %v397_v28, %v417_v10 }
 0x1c4   :  { %v407_v44 = vsel %vm403_vm2, %v388_v15, -inf  ;;  %940 = vrot.lane.b32.xlu2 %v1895_v57, %s1643_s5  ;;  %938 = vrot.lane.b32.xlu1 %v3197_v39, %s1643_s5 }
 0x1c5   :  { %v427_v8 = vmax.f32 %v387_v51, %v407_v44  ;;  %936 = vrot.lane.b32.xlu0 %v1743_v23, %s1643_s5  ;;  %v444_v63 = vrot.slane %v443_v4, 2  ;;  %v3200_v44 = vrot.slane %v3199_v25, 1 }
 0x1c6   :  { %v2305_v40 = vpop.permute.xlu2 %581  ;;  %v574_v6 = vpop.permute.xlu1 %573 }
 0x1c7   :  { %v428_v60 = vrot.slane %v427_v8, 4  ;;  %v566_v36 = vpop.permute.xlu0 %565  ;;  %v602_v54 = vrot.slane %v2305_v40, 1  ;;  %v598_v33 = vrot.slane %v574_v6, 1  ;;  %v445_v56 = vmax.f32 %v443_v4, %v444_v63  ;;  %v3202_v4 = vld [vmem:[#allocation17_spill] sm:$0xff] }
 0x1c8   :  { %v594_v51 = vrot.slane %v566_v36, 1  ;;  %v3203_v10 = vrot.slane %v3202_v4, 1  ;;  %v3207_v4 = vld [vmem:[#allocation15_spill] sm:$0xff] }
 0x1c9   :  { %v429_v15 = vmax.f32 %v427_v8, %v428_v60  ;;  %v611_v5 = vsel %vm287_vm0, %v3198_v58, %v602_v54  ;;  %v614_v45 = vsel %vm287_vm0, %v598_v33, %v3200_v44  ;;  %v615_v50 = vsel %vm287_vm0, %v3201_v0, %v598_v33  ;;  %v3205_v60 = vld [vmem:[#allocation29_spill] sm:$0xff]  ;;  %v3206_v0 = vld [vmem:[#allocation27_spill] sm:$0xff] }
 0x1ca   :  { %v446_v35 = vrot.slane %v445_v56, 1  ;;  %v618_v8 = vsel %vm287_vm0, %v594_v51, %v3203_v10  ;;  %v619_v28 = vsel %vm287_vm0, %v3204_v53, %v594_v51  ;;  %v2331_v63 = vadd.f32 %v611_v5, %v2222_v12 }
 0x1cb   :  { %v430_v6 = vrot.slane %v429_v15, 2  ;;  %v625_v13 = vadd.f32 %v619_v28, %v3205_v60  ;;  %v626_v36 = vadd.f32 %v618_v8, %v2141_v38  ;;  %v629_v33 = vadd.f32 %v615_v50, %v3206_v0  ;;  %v3211_v60 = vld [vmem:[#allocation13_spill] sm:$0xff] }
 0x1cc   :  { %v454_v58 = vmax.f32 %v452_v27, %v453_v31  ;;  %v447_v25 = vmax.f32 %v445_v56, %v446_v35  ;;  %v630_v44 = vadd.f32 %v614_v45, %v542_v34  ;;  %946 = vrot.lane.b32.xlu2 %v3207_v4, %s1643_s5  ;;  %944 = vrot.lane.b32.xlu1 %v1735_v22, %s1643_s5  ;;  %v3209_v51 = vrot.slane %v3208_v14, 2 }
 0x1cd   :  { %v3210_v12 = vrot.slane %v2196_v7, 2  ;;  %v431_v10 = vmax.f32 %v429_v15, %v430_v6  ;;  %942 = vrot.lane.b32.xlu0 %v1703_v18, %s1643_s5  ;;  %v2349_v38 = vadd.f32 %v2211_v46, %v629_v33  ;;  %v463_v45 = vrot.slane %v462_v9, 4 }
 0x1ce   :  { %v2351_v34 = vpop.permute.xlu2 %665  ;;  %v646_v27 = vpop.permute.xlu1 %645  ;;  %v280_v56 = vrot.slane %v2219_v32, 1  ;;  %v490_v8 = vmax.f32 %v482_v59, 0.0  ;;  %v480_v15 = vadd.f32 %v2287_v49, %v426_v29  ;;  %v484_v53 = vadd.f32 %v2287_v49, %v454_v58 }
 0x1cf   :  { %v694_v5 = vsel %vm368_vm1, %v3210_v12, %v3209_v51  ;;  %v432_v50 = vrot.slane %v431_v10, 1  ;;  %v268_v7 = vpop.permute.xlu0 %267  ;;  %v674_v35 = vrot.slane %v646_v27, 2  ;;  %v483_v28 = vadd.f32 %v2287_v49, %v447_v25  ;;  %v3215_v25 = vld [vmem:[#allocation34_spill] sm:$0xff] }
 0x1d0   :  { %v2353_v31 = vadd.f32 %v694_v5, %v630_v44  ;;  %v284_v6 = vrot.slane %v268_v7, 1  ;;  %v3212_v0 = vrot.slane %v3211_v60, 2  ;;  %v3213_v44 = vrot.slane %v2147_v52, 2 }
 0x1d1   :  { %v433_v46 = vmax.f32 %v431_v10, %v432_v50  ;;  %v464_v14 = vmax.f32 %v462_v9, %v463_v45  ;;  %v3214_v29 = vrot.slane %v1841_v42, 1  ;;  %v3216_v51 = vrot.slane %v3215_v25, 1 }
 0x1d2   :  { %v698_v33 = vsel %vm368_vm1, %v674_v35, %v3212_v0  ;;  %v699_v32 = vsel %vm368_vm1, %v3213_v44, %v674_v35  ;;  %v507_v52 = vrot.slane %v490_v8, 6  ;;  %v488_v27 = vmax.f32 %v480_v15, 0.0  ;;  %v3220_v35 = vld [vmem:[#allocation25_spill] sm:$0xff] }
 0x1d3   :  { %v2367_v59 = vadd.f32 %v699_v32, %v625_v13  ;;  %v291_v58 = vsel %vm287_vm0, %v280_v56, %v3214_v29  ;;  %v292_v12 = vsel %vm287_vm0, %v3216_v51, %v280_v56  ;;  %v481_v5 = vadd.f32 %v2287_v49, %v433_v46  ;;  %v3218_v56 = vld [vmem:[#allocation14_spill] sm:$0xff] }
 0x1d4   :  { %v2378_v10 = vadd.f32 %v698_v33, %v626_v36  ;;  %v492_v50 = vmax.f32 %v484_v53, 0.0  ;;  %952 = vrot.lane.b32.xlu2 %v1727_v21, %s1633_s20  ;;  %950 = vrot.lane.b32.xlu1 %v1681_v16, %s1633_s20  ;;  %v491_v42 = vmax.f32 %v483_v28, 0.0  ;;  %v3217_v13 = vrot.slane %v1971_v62, 1 }
 0x1d5   :  { %v489_v9 = vmax.f32 %v481_v5, 0.0  ;;  %v3219_v7 = vrot.slane %v3218_v56, 1  ;;  %948 = vrot.lane.b32.xlu0 %v3220_v35, %s1643_s5  ;;  %v465_v8 = vrot.slane %v464_v14, 2  ;;  %v314_v15 = vadd.f32 %v292_v12, %v3197_v39 }
 0x1d6   :  { %v288_v45 = vsel %vm287_vm0, %v3217_v13, %v284_v6  ;;  %v315_v53 = vadd.f32 %v291_v58, %v1895_v57  ;;  %v2396_v28 = vpop.permute.xlu2 %719  ;;  %v351_v62 = vpop.permute.xlu1 %350  ;;  %v510_v32 = vrot.slane %v491_v42, 5  ;;  %v3221_v58 = vrot.slane %v2198_v61, 2 }
 0x1d7   :  { %v303_v36 = vsel %vm287_vm0, %v284_v6, %v3219_v7  ;;  %v504_v46 = vrot.slane %v489_v9, 7  ;;  %v343_v60 = vpop.permute.xlu0 %342  ;;  %v367_v0 = vrot.slane %v351_v62, 2  ;;  %v318_v33 = vadd.f32 %v288_v45, %v3207_v4 }
 0x1d8   :  { %v319_v6 = vadd.f32 %v303_v36, %v3220_v35  ;;  %v363_v44 = vrot.slane %v343_v60, 2  ;;  %v3222_v51 = vrot.slane %v1799_v30, 2  ;;  %v3223_v5 = vrot.slane %v1839_v41, 2 }
 0x1d9   :  { %v506_v29 = vsel %vm505_vm3, %v504_v46, %v488_v27  ;;  %v369_v25 = vsel %vm368_vm1, %v3221_v58, %v367_v0  ;;  %v3224_v13 = vrot.slane %v1981_v11, 2  ;;  %v513_v45 = vrot.slane %v492_v50, 4 }
 0x1da   :  { %v384_v12 = vsel %vm368_vm1, %v367_v0, %v3222_v51  ;;  %v372_v9 = vsel %vm368_vm1, %v363_v44, %v3223_v5  ;;  %v399_v42 = vadd.f32 %v369_v25, %v318_v33  ;;  %v509_v30 = vsel %vm508_vm4, %v507_v52, %v506_v29  ;;  %v3227_v51 = vld [vmem:[#allocation35_spill] sm:$0xff] }
 0x1db   :  { %v373_v27 = vsel %vm368_vm1, %v3224_v13, %v363_v44  ;;  %v400_v61 = vadd.f32 %v384_v12, %v319_v6  ;;  %v396_v7 = vadd.f32 %v372_v9, %v315_v53  ;;  %v512_v41 = vsel %vm511_vm5, %v510_v32, %v509_v30  ;;  %v3225_v32 = vld [vmem:[#allocation31_spill] sm:$0xff] }
 0x1dc   :  { %v395_v56 = vadd.f32 %v373_v27, %v314_v15  ;;  %958 = vrot.lane.b32.xlu2 %v1683_v17, %s1633_s20  ;;  %956 = vrot.lane.b32.xlu1 %v1843_v43, %s1633_s20  ;;  %v466_v11 = vmax.f32 %v464_v14, %v465_v8  ;;  %v515_v52 = vsel %vm514_vm6, %v513_v45, %v512_v41  ;;  %v3226_v29 = vrot.slane %v3225_v32, 1 }
 0x1dd   :  { %v419_v36 = vsel %vm403_vm2, %v400_v61, -inf  ;;  %v415_v62 = vsel %vm403_vm2, %v396_v7, -inf  ;;  %954 = vrot.lane.b32.xlu0 %v1763_v24, %s1633_s20 }
 0x1de   :  { %v469_v50 = vmax.f32 %v399_v42, %v419_v36  ;;  %v455_v15 = vmax.f32 %v395_v56, %v415_v62  ;;  %v2430_v53 = vpop.permute.xlu2 %725  ;;  %v2432_v46 = vpop.permute.xlu1 %549  ;;  %v467_v8 = vrot.slane %v466_v11, 1 }
 0x1df   :  { %v2434_v0 = vpop.permute.xlu0 %589 }
 0x1e0   :  { %v470_v60 = vrot.slane %v469_v50, 4  ;;  %v456_v33 = vrot.slane %v455_v15, 4  ;;  %v606_v14 = vrot.slane %v2434_v0, 1  ;;  %v468_v9 = vmax.f32 %v466_v11, %v467_v8  ;;  %v3228_v11 = vld [vmem:[#allocation33_spill] sm:$0xff] }
 0x1e2   :  { %v471_v6 = vmax.f32 %v469_v50, %v470_v60  ;;  %v457_v44 = vmax.f32 %v455_v15, %v456_v33  ;;  %v607_v58 = vsel %vm287_vm0, %v3226_v29, %v606_v14  ;;  %v486_v36 = vadd.f32 %v2287_v49, %v468_v9 }
 0x1e3   :  { %v2444_v12 = vadd.f32 %v607_v58, %v3227_v51  ;;  %v3229_v50 = vrot.slane %v3228_v11, 2  ;;  %v3230_v51 = vld [vmem:[#allocation20_spill] sm:$0xff] }
 0x1e4   :  { %v472_v25 = vrot.slane %v471_v6, 2  ;;  %v458_v5 = vrot.slane %v457_v44, 2  ;;  %964 = vrot.lane.b32.xlu2 %v1857_v47, %s1633_s20  ;;  %962 = vrot.lane.b32.xlu1 %v1773_v26, %s1633_s20 }
 0x1e5   :  { %960 = vrot.lane.b32.xlu0 %v1719_v20, %s1633_s20 }
 0x1e6   :  { %v473_v13 = vmax.f32 %v471_v6, %v472_v25  ;;  %v459_v27 = vmax.f32 %v457_v44, %v458_v5  ;;  %v2452_v42 = vpop.permute.xlu2 %731  ;;  %v2454_v61 = vpop.permute.xlu1 %663  ;;  %v494_v6 = vmax.f32 %v486_v36, 0.0  ;;  %v591_v5 = vrot.slane %v3230_v51, 1  ;;  %v3232_v36 = vld [vmem:[#allocation23_spill] sm:$0xff] }
 0x1e7   :  { %v2456_v56 = vpop.permute.xlu0 %661 }
 0x1e8   :  { %v474_v45 = vrot.slane %v473_v13, 1  ;;  %v460_v7 = vrot.slane %v459_v27, 1  ;;  %v3150_v30 = vrot.slane %v2456_v56, 2  ;;  %v519_v25 = vrot.slane %v494_v6, 2 }
 0x1ea   :  { %v475_v41 = vmax.f32 %v473_v13, %v474_v45  ;;  %v461_v62 = vmax.f32 %v459_v27, %v460_v7  ;;  %v691_v15 = vsel %vm368_vm1, %v3229_v50, %v3150_v30  ;;  %v3231_v45 = vld [vmem:[#allocation19_spill] sm:$0xff] }
 0x1eb   :  { %v2467_v60 = vadd.f32 %v691_v15, %v2331_v63  ;;  %v3149_v7 = vrot.slane %v3231_v45, 2 }
 0x1ec   :  { %v487_v33 = vadd.f32 %v2287_v49, %v475_v41  ;;  %v485_v8 = vadd.f32 %v2287_v49, %v461_v62  ;;  %970 = vrot.lane.b32.xlu2 %v3197_v39, %s1633_s20  ;;  %968 = vrot.lane.b32.xlu1 %v1743_v23, %s1633_s20  ;;  %v3233_v41 = vrot.slane %v3232_v36, 1 }
 0x1ed   :  { %966 = vrot.lane.b32.xlu0 %v1711_v19, %s1633_s20 }
 0x1ee   :  { %v493_v44 = vmax.f32 %v485_v8, 0.0  ;;  %v2477_v32 = vpop.permute.xlu2 %737  ;;  %v2479_v29 = vpop.permute.xlu1 %669  ;;  %v495_v63 = vmax.f32 %v487_v33, 0.0  ;;  %v621_v62 = vsel %vm287_vm0, %v591_v5, %v3233_v41  ;;  %v3235_v8 = vld [vmem:[#allocation12_spill] sm:$0xff] }
 0x1ef   :  { %v2481_v58 = vpop.permute.xlu0 %667  ;;  %v623_v6 = vadd.f32 %v621_v62, %v3235_v8  ;;  %v3236_v8 = vld [vmem:[#allocation22_spill] sm:$0xff] }
 0x1f0   :  { %v516_v49 = vrot.slane %v493_v44, 3  ;;  %v522_v13 = vrot.slane %v495_v63, 1 }
 0x1f2   :  { %v518_v9 = vsel %vm517_vm7, %v516_v49, %v515_v52  ;;  %v3234_v52 = vrot.slane %v1891_v55, 2  ;;  %v3148_v49 = vrot.slane %v2396_v28, 3 }
 0x1f3   :  { %v521_v27 = vsel %vm520_vm8, %v519_v25, %v518_v9 }
 0x1f4   :  { %976 = vrot.lane.b32.xlu2 %v1735_v22, %s1633_s20  ;;  %974 = vrot.lane.b32.xlu1 %v1703_v18, %s1633_s20  ;;  %v524_v11 = vsel %vm523_vm9, %v522_v13, %v521_v27  ;;  %v701_v50 = vsel %vm368_vm1, %v3149_v7, %v3234_v52  ;;  %v754_v52 = vrot.slane %v2430_v53, 3 }
 0x1f5   :  { %972 = vrot.lane.b32.xlu0 %v1895_v57, %s1633_s20  ;;  %526 = vst [vmem:[#allocation8] sm:$0xff] %v524_v11  ;;  %v703_v51 = vadd.f32 %v701_v50, %v623_v6  ;;  %v603_v6 = vrot.slane %v3236_v8, 1 }
 0x1f6   :  { %v2504_v15 = vpop.permute.xlu2 %743  ;;  %v724_v33 = vpop.permute.xlu1 %723 }
 0x1f7   :  { %v722_v44 = vpop.permute.xlu0 %721  ;;  %v753_v63 = vrot.slane %v724_v33, 3  ;;  %v610_v0 = vsel %vm287_vm0, %v602_v54, %v603_v6 }
 0x1f8   :  { %v752_v25 = vrot.slane %v722_v44, 3 }
 0x1fa   :  { %v782_v55 = vsel %vm767_vm10, %v3148_v49, %v752_v25  ;;  %v781_v9 = vsel %vm767_vm10, %v752_v25, %v753_v63  ;;  %v3240_v49 = vld [vmem:[#allocation36_spill] sm:$0xff] }
 0x1fb   :  { %v784_v13 = vadd.f32 %v782_v55, %v703_v51  ;;  %v785_v27 = vadd.f32 %v781_v9, %v2177_v48  ;;  %v757_v48 = vrot.slane %v2452_v42, 3  ;;  %v780_v51 = vsel %vm767_vm10, %v753_v63, %v754_v52  ;;  %v3237_v9 = vld [vmem:[#allocation26_spill] sm:$0xff]  ;;  %v3239_v63 = vld [vmem:[#allocation28_spill] sm:$0xff] }
 0x1fc   :  { %1030 = vrot.lane.b32.xlu2 %v1681_v16, %s1644_s6  ;;  %980 = vrot.lane.b32.xlu1 %v3220_v35, %s1633_s20 }
 0x1fd   :  { %v803_v36 = vsel %vm801_vm11, %v785_v27, -inf  ;;  %978 = vrot.lane.b32.xlu0 %v3207_v4, %s1633_s20 }
 0x1fe   :  { %v818_v41 = vmax.f32 %v784_v13, %v803_v36  ;;  %v2525_v62 = vpop.permute.xlu2 %749  ;;  %v730_v11 = vpop.permute.xlu1 %729  ;;  %v3238_v13 = vrot.slane %v3237_v9, 1  ;;  %v786_v9 = vadd.f32 %v780_v51, %v2367_v59  ;;  %v622_v59 = vsel %vm287_vm0, %v606_v14, %v591_v5 }
 0x1ff   :  { %v728_v50 = vpop.permute.xlu0 %727  ;;  %v756_v33 = vrot.slane %v730_v11, 3  ;;  %v683_v11 = vrot.slane %v2454_v61, 2 }
 0x200   :  { %v819_v44 = vrot.slane %v818_v41, 4  ;;  %v755_v25 = vrot.slane %v728_v50, 3  ;;  %v609_v27 = vsel %vm287_vm0, %v603_v6, %v3238_v13  ;;  %v685_v13 = vrot.slane %v2481_v58, 2 }
 0x201   :  { %v777_v55 = vsel %vm767_vm10, %v756_v33, %v757_v48 }
 0x202   :  { %v820_v53 = vmax.f32 %v818_v41, %v819_v44  ;;  %v779_v42 = vsel %vm767_vm10, %v754_v52, %v755_v25  ;;  %v778_v36 = vsel %vm767_vm10, %v755_v25, %v756_v33  ;;  %v789_v7 = vadd.f32 %v777_v55, %v3240_v49  ;;  %v3241_v41 = vld [vmem:[#allocation18_spill] sm:$0xff] }
 0x203   :  { %v787_v50 = vadd.f32 %v779_v42, %v2378_v10  ;;  %v788_v8 = vadd.f32 %v778_v36, %v3239_v63  ;;  %v635_v52 = vadd.f32 %v609_v27, %v3241_v41  ;;  %v684_v33 = vrot.slane %v2351_v34, 2 }
 0x204   :  { %v821_v30 = vrot.slane %v820_v53, 2  ;;  %1036 = vrot.lane.b32.xlu2 %v1843_v43, %s1644_s6  ;;  %1034 = vrot.lane.b32.xlu1 %v1763_v24, %s1644_s6  ;;  %v807_v61 = vsel %vm801_vm11, %v789_v7, -inf  ;;  %v686_v7 = vrot.slane %v2479_v29, 2  ;;  %v634_v36 = vadd.f32 %v610_v0, %v2432_v46 }
 0x205   :  { %v805_v10 = vsel %vm801_vm11, %v787_v50, -inf  ;;  %1032 = vrot.lane.b32.xlu0 %v1727_v21, %s1644_s6  ;;  %v832_v25 = vmax.f32 %v788_v8, %v807_v61  ;;  %v689_v55 = vsel %vm368_vm1, %v683_v11, %v684_v33  ;;  %v3242_v50 = vrot.slane %v2456_v56, 2 }
 0x206   :  { %v822_v49 = vmax.f32 %v820_v53, %v821_v30  ;;  %v825_v44 = vmax.f32 %v786_v9, %v805_v10  ;;  %v2563_v51 = vpop.permute.xlu2 %922  ;;  %v736_v34 = vpop.permute.xlu1 %735  ;;  %v638_v53 = vadd.f32 %v622_v59, %v2268_v1  ;;  %v2579_v63 = vadd.f32 %v689_v55, %v635_v52 }
 0x207   :  { %v734_v27 = vpop.permute.xlu0 %733  ;;  %v759_v42 = vrot.slane %v736_v34, 3  ;;  %v833_v30 = vrot.slane %v832_v25, 4  ;;  %v690_v58 = vsel %vm368_vm1, %v3242_v50, %v683_v11  ;;  %v688_v6 = vsel %vm368_vm1, %v684_v33, %v685_v13  ;;  %v2601_v33 = vld [vmem:[#allocation7 + $0x1] ss:$0 sm:$0xff] }
 0x208   :  { %v826_v14 = vrot.slane %v825_v44, 4  ;;  %v758_v5 = vrot.slane %v734_v27, 3  ;;  %v823_v29 = vrot.slane %v822_v49, 1  ;;  %v3243_v1 = vrot.slane %v3231_v45, 2  ;;  %v3244_v27 = vld [vmem:[#allocation32_spill] sm:$0xff] }
 0x209   :  { %v834_v40 = vmax.f32 %v832_v25, %v833_v30  ;;  %v766_v41 = vrot.slane %v2525_v62, 3  ;;  %v714_v45 = vadd.f32 %v690_v58, %v634_v36  ;;  %v763_v0 = vrot.slane %v2504_v15, 3 }
 0x20a   :  { %v827_v8 = vmax.f32 %v825_v44, %v826_v14  ;;  %v776_v54 = vsel %vm767_vm10, %v757_v48, %v758_v5  ;;  %v702_v46 = vsel %vm368_vm1, %v686_v7, %v3243_v1  ;;  %v775_v11 = vsel %vm767_vm10, %v758_v5, %v759_v42 }
 0x20b   :  { %v790_v56 = vadd.f32 %v776_v54, %v2349_v38  ;;  %v835_v52 = vrot.slane %v834_v40, 2  ;;  %v791_v10 = vadd.f32 %v775_v11, %v2353_v31  ;;  %v760_v48 = vrot.slane %v2477_v32, 3 }
 0x20c   :  { %v828_v9 = vrot.slane %v827_v8, 2  ;;  %1042 = vrot.lane.b32.xlu2 %v1773_v26, %s1644_s6  ;;  %1040 = vrot.lane.b32.xlu1 %v1719_v20, %s1644_s6  ;;  %v687_v38 = vsel %vm368_vm1, %v685_v13, %v686_v7  ;;  %v824_v61 = vmax.f32 %v822_v49, %v823_v29  ;;  %v718_v59 = vadd.f32 %v702_v46, %v638_v53 }
 0x20d   :  { %1038 = vrot.lane.b32.xlu0 %v1683_v17, %s1644_s6  ;;  %v836_v44 = vmax.f32 %v834_v40, %v835_v52  ;;  %v809_v25 = vsel %vm801_vm11, %v791_v10, -inf  ;;  %v716_v32 = vadd.f32 %v688_v6, %v3244_v27  ;;  %v3245_v30 = vrot.slane %v2396_v28, 3 }
 0x20e   :  { %v829_v31 = vmax.f32 %v827_v8, %v828_v9  ;;  %v2607_v34 = vpop.permute.xlu2 %928  ;;  %v742_v55 = vpop.permute.xlu1 %741  ;;  %v839_v13 = vmax.f32 %v790_v56, %v809_v25  ;;  %v878_v50 = vadd.f32 %v2601_v33, %v824_v61  ;;  %v774_v58 = vsel %vm767_vm10, %v759_v42, %v760_v48  ;;  %v3246_v9 = vld [vmem:[#allocation30_spill] sm:$0xff] }
 0x20f   :  { %v740_v7 = vpop.permute.xlu0 %739  ;;  %v762_v14 = vrot.slane %v742_v55, 3  ;;  %v783_v5 = vsel %vm767_vm10, %v766_v41, %v3245_v30  ;;  %v837_v53 = vrot.slane %v836_v44, 1  ;;  %v792_v52 = vadd.f32 %v774_v58, %v3246_v9 }
 0x210   :  { %v830_v49 = vrot.slane %v829_v31, 1  ;;  %v761_v36 = vrot.slane %v740_v7, 3  ;;  %v840_v29 = vrot.slane %v839_v13, 4  ;;  %v799_v10 = vadd.f32 %v783_v5, %v718_v59 }
 0x211   :  { %v771_v15 = vsel %vm767_vm10, %v762_v14, %v763_v0  ;;  %v838_v40 = vmax.f32 %v836_v44, %v837_v53  ;;  %v717_v27 = vadd.f32 %v687_v38, %v2444_v12  ;;  %v886_v59 = vmax.f32 %v878_v50, 0.0 }
 0x212   :  { %v831_v8 = vmax.f32 %v829_v31, %v830_v49  ;;  %v773_v28 = vsel %vm767_vm10, %v760_v48, %v761_v36  ;;  %v772_v54 = vsel %vm767_vm10, %v761_v36, %v762_v14  ;;  %v841_v6 = vmax.f32 %v839_v13, %v840_v29 }
 0x213   :  { %v793_v1 = vadd.f32 %v773_v28, %v2184_v37  ;;  %v794_v46 = vadd.f32 %v772_v54, %v2467_v60  ;;  %v795_v56 = vadd.f32 %v771_v15, %v714_v45  ;;  %v880_v11 = vadd.f32 %v2601_v33, %v838_v40 }
 0x214   :  { %v879_v42 = vadd.f32 %v2601_v33, %v831_v8  ;;  %1048 = vrot.lane.b32.xlu2 %v1743_v23, %s1644_s6  ;;  %1046 = vrot.lane.b32.xlu1 %v1711_v19, %s1644_s6  ;;  %v842_v48 = vrot.slane %v841_v6, 2  ;;  %v817_v36 = vsel %vm801_vm11, %v799_v10, -inf }
 0x215   :  { %v811_v37 = vsel %vm801_vm11, %v793_v1, -inf  ;;  %v813_v60 = vsel %vm801_vm11, %v795_v56, -inf  ;;  %1044 = vrot.lane.b32.xlu0 %v1857_v47, %s1644_s6  ;;  %v888_v61 = vmax.f32 %v880_v11, 0.0 }
 0x216   :  { %v887_v45 = vmax.f32 %v879_v42, 0.0  ;;  %v846_v31 = vmax.f32 %v792_v52, %v811_v37  ;;  %v853_v44 = vmax.f32 %v794_v46, %v813_v60  ;;  %v2641_v25 = vpop.permute.xlu2 %934  ;;  %v748_v55 = vpop.permute.xlu1 %747  ;;  %v843_v13 = vmax.f32 %v841_v6, %v842_v48 }
 0x217   :  { %v746_v7 = vpop.permute.xlu0 %745  ;;  %v765_v14 = vrot.slane %v748_v55, 3  ;;  %v904_v30 = vrot.slane %v888_v61, 6 }
 0x218   :  { %v902_v49 = vrot.slane %v887_v45, 7  ;;  %v847_v5 = vrot.slane %v846_v31, 4  ;;  %v854_v53 = vrot.slane %v853_v44, 4  ;;  %v844_v58 = vrot.slane %v843_v13, 1 }
 0x219   :  { %v764_v29 = vrot.slane %v746_v7, 3  ;;  %v768_v15 = vsel %vm767_vm10, %v765_v14, %v766_v41 }
 0x21a   :  { %v903_v12 = vsel %vm505_vm3, %v902_v49, %v886_v59  ;;  %v848_v38 = vmax.f32 %v846_v31, %v847_v5  ;;  %v855_v50 = vmax.f32 %v853_v44, %v854_v53  ;;  %v798_v8 = vadd.f32 %v768_v15, %v717_v27 }
 0x21b   :  { %v845_v40 = vmax.f32 %v843_v13, %v844_v58  ;;  %v770_v28 = vsel %vm767_vm10, %v763_v0, %v764_v29  ;;  %v769_v54 = vsel %vm767_vm10, %v764_v29, %v765_v14  ;;  %v905_v6 = vsel %vm508_vm4, %v904_v30, %v903_v12 }
 0x21c   :  { %v849_v1 = vrot.slane %v848_v38, 2  ;;  %v856_v46 = vrot.slane %v855_v50, 2  ;;  %v796_v62 = vadd.f32 %v770_v28, %v2579_v63  ;;  %v797_v56 = vadd.f32 %v769_v54, %v716_v32  ;;  %1054 = vrot.lane.b32.xlu2 %v1703_v18, %s1644_s6  ;;  %1052 = vrot.lane.b32.xlu1 %v1895_v57, %s1644_s6 }
 0x21d   :  { %v881_v41 = vadd.f32 %v2601_v33, %v845_v40  ;;  %v867_v42 = vmax.f32 %v798_v8, %v817_v36  ;;  %1050 = vrot.lane.b32.xlu0 %v3197_v39, %s1644_s6 }
 0x21e   :  { %v850_v0 = vmax.f32 %v848_v38, %v849_v1  ;;  %v857_v11 = vmax.f32 %v855_v50, %v856_v46  ;;  %v815_v9 = vsel %vm801_vm11, %v797_v56, -inf  ;;  %v2666_v52 = vpop.permute.xlu2 %940  ;;  %v2668_v63 = vpop.permute.xlu1 %920 }
 0x21f   :  { %v889_v32 = vmax.f32 %v881_v41, 0.0  ;;  %v860_v10 = vmax.f32 %v796_v62, %v815_v9  ;;  %v868_v48 = vrot.slane %v867_v42, 4  ;;  %v2670_v37 = vpop.permute.xlu0 %918 }
 0x220   :  { %v851_v60 = vrot.slane %v850_v0, 1  ;;  %v858_v45 = vrot.slane %v857_v11, 1 }
 0x221   :  { %v906_v61 = vrot.slane %v889_v32, 5  ;;  %v861_v31 = vrot.slane %v860_v10, 4  ;;  %v869_v44 = vmax.f32 %v867_v42, %v868_v48 }
 0x222   :  { %v852_v55 = vmax.f32 %v850_v0, %v851_v60  ;;  %v859_v27 = vmax.f32 %v857_v11, %v858_v45 }
 0x223   :  { %v862_v59 = vmax.f32 %v860_v10, %v861_v31  ;;  %v870_v13 = vrot.slane %v869_v44, 2  ;;  %v907_v7 = vsel %vm511_vm5, %v906_v61, %v905_v6 }
 0x224   :  { %v882_v14 = vadd.f32 %v2601_v33, %v852_v55  ;;  %v883_v49 = vadd.f32 %v2601_v33, %v859_v27  ;;  %1060 = vrot.lane.b32.xlu2 %v3220_v35, %s1644_s6  ;;  %1058 = vrot.lane.b32.xlu1 %v3207_v4, %s1644_s6 }
 0x225   :  { %v863_v30 = vrot.slane %v862_v59, 2  ;;  %v871_v5 = vmax.f32 %v869_v44, %v870_v13  ;;  %1056 = vrot.lane.b32.xlu0 %v1735_v22, %s1644_s6 }
 0x226   :  { %v890_v53 = vmax.f32 %v882_v14, 0.0  ;;  %v891_v36 = vmax.f32 %v883_v49, 0.0  ;;  %v2681_v58 = vpop.permute.xlu2 %946  ;;  %v2683_v29 = vpop.permute.xlu1 %926 }
 0x227   :  { %v864_v15 = vmax.f32 %v862_v59, %v863_v30  ;;  %v872_v12 = vrot.slane %v871_v5, 1  ;;  %v925_v38 = vpop.permute.xlu0 %924 }
 0x228   :  { %v908_v50 = vrot.slane %v890_v53, 4  ;;  %v910_v8 = vrot.slane %v891_v36, 3 }
 0x229   :  { %v865_v40 = vrot.slane %v864_v15, 1  ;;  %v873_v28 = vmax.f32 %v871_v5, %v872_v12 }
 0x22a   :  { %v909_v54 = vsel %vm514_vm6, %v908_v50, %v907_v7 }
 0x22b   :  { %v866_v6 = vmax.f32 %v864_v15, %v865_v40  ;;  %v885_v1 = vadd.f32 %v2601_v33, %v873_v28  ;;  %v911_v46 = vsel %vm517_vm7, %v910_v8, %v909_v54 }
 0x22c   :  { %1114 = vrot.lane.b32.xlu2 %v1763_v24, %s1645_s7  ;;  %1112 = vrot.lane.b32.xlu1 %v1727_v21, %s1645_s7 }
 0x22d   :  { %v884_v62 = vadd.f32 %v2601_v33, %v866_v6  ;;  %1110 = vrot.lane.b32.xlu0 %v1681_v16, %s1645_s7  ;;  %v893_v42 = vmax.f32 %v885_v1, 0.0 }
 0x22e   :  { %v953_v56 = vpop.permute.xlu2 %952  ;;  %v2695_v41 = vpop.permute.xlu1 %932 }
 0x22f   :  { %v931_v0 = vpop.permute.xlu0 %930  ;;  %v892_v11 = vmax.f32 %v884_v62, 0.0  ;;  %v914_v32 = vrot.slane %v893_v42, 1  ;;  %v983_v59 = vrot.slane %v953_v56, 1 }
 0x231   :  { %v912_v9 = vrot.slane %v892_v11, 2 }
 0x233   :  { %v913_v10 = vsel %vm520_vm8, %v912_v9, %v911_v46 }
 0x234   :  { %1120 = vrot.lane.b32.xlu2 %v1719_v20, %s1645_s7  ;;  %1118 = vrot.lane.b32.xlu1 %v1683_v17, %s1645_s7  ;;  %v915_v33 = vsel %vm523_vm9, %v914_v32, %v913_v10 }
 0x235   :  { %1116 = vrot.lane.b32.xlu0 %v1843_v43, %s1645_s7  ;;  %917 = vst [vmem:[#allocation8 + $0x8] sm:$0xff] %v915_v33 }
 0x236   :  { %v959_v48 = vpop.permute.xlu2 %958  ;;  %v2705_v60 = vpop.permute.xlu1 %938 }
 0x237   :  { %v937_v45 = vpop.permute.xlu0 %936  ;;  %v986_v30 = vrot.slane %v959_v48, 1 }
 0x23c   :  { %1126 = vrot.lane.b32.xlu2 %v1711_v19, %s1645_s7  ;;  %1124 = vrot.lane.b32.xlu1 %v1857_v47, %s1645_s7 }
 0x23d   :  { %1122 = vrot.lane.b32.xlu0 %v1773_v26, %s1645_s7 }
 0x23e   :  { %v965_v61 = vpop.permute.xlu2 %964  ;;  %v2713_v31 = vpop.permute.xlu1 %944 }
 0x23f   :  { %v2715_v44 = vpop.permute.xlu0 %942  ;;  %v989_v40 = vrot.slane %v965_v61, 1 }
 0x244   :  { %1128 = vrot.lane.b32.xlu2 %v1743_v23, %s1645_s7  ;;  %1198 = vrot.lane.b32.xlu1 %v1683_v17, %s1646_s8 }
 0x245   :  { %1196 = vrot.lane.b32.xlu0 %v1843_v43, %s1646_s8 }
 0x246   :  { %v971_v55 = vpop.permute.xlu2 %970  ;;  %v2723_v27 = vpop.permute.xlu1 %950 }
 0x247   :  { %v2725_v13 = vpop.permute.xlu0 %948  ;;  %v982_v7 = vrot.slane %v2723_v27, 1  ;;  %v992_v42 = vrot.slane %v971_v55, 1 }
 0x249   :  { %v1012_v14 = vsel %vm287_vm0, %v982_v7, %v983_v59 }
 0x24a   :  { %v2733_v49 = vadd.f32 %v1012_v14, %v2670_v37 }
 0x24c   :  { %1200 = vrot.lane.b32.xlu2 %v1719_v20, %s1646_s8  ;;  %1194 = vrot.lane.b32.xlu1 %v1763_v24, %s1646_s8 }
 0x24d   :  { %1130 = vrot.lane.b32.xlu0 %v3197_v39, %s1645_s7 }
 0x24e   :  { %v2741_v17 = vpop.permute.xlu2 %976  ;;  %v957_v43 = vpop.permute.xlu1 %956 }
 0x24f   :  { %v955_v5 = vpop.permute.xlu0 %954  ;;  %v985_v53 = vrot.slane %v957_v43, 1  ;;  %v995_v48 = vrot.slane %v2741_v17, 1 }
 0x250   :  { %v984_v36 = vrot.slane %v955_v5, 1 }
 0x251   :  { %v1009_v37 = vsel %vm287_vm0, %v985_v53, %v986_v30 }
 0x252   :  { %v1011_v15 = vsel %vm287_vm0, %v983_v59, %v984_v36  ;;  %v2749_v20 = vsel %vm287_vm0, %v984_v36, %v985_v53  ;;  %v2751_v24 = vadd.f32 %v1009_v37, %v925_v38 }
 0x253   :  { %v2754_v12 = vadd.f32 %v1011_v15, %v2668_v63 }
 0x254   :  { %1134 = vrot.lane.b32.xlu2 %v1703_v18, %s1645_s7  ;;  %1132 = vrot.lane.b32.xlu1 %v1895_v57, %s1645_s7 }
 0x255   :  { %1202 = vrot.lane.b32.xlu0 %v1773_v26, %s1646_s8 }
 0x256   :  { %v2762_v50 = vpop.permute.xlu2 %1030  ;;  %v963_v8 = vpop.permute.xlu1 %962 }
 0x257   :  { %v961_v28 = vpop.permute.xlu0 %960  ;;  %v988_v54 = vrot.slane %v963_v8, 1 }
 0x258   :  { %v987_v38 = vrot.slane %v961_v28, 1 }
 0x259   :  { %v1006_v63 = vsel %vm287_vm0, %v988_v54, %v989_v40 }
 0x25a   :  { %v1008_v6 = vsel %vm287_vm0, %v986_v30, %v987_v38  ;;  %v2770_v1 = vsel %vm287_vm0, %v987_v38, %v988_v54  ;;  %v2772_v46 = vadd.f32 %v1006_v63, %v931_v0 }
 0x25b   :  { %v2775_v26 = vadd.f32 %v1008_v6, %v2683_v29 }
 0x25c   :  { %1206 = vrot.lane.b32.xlu2 %v1711_v19, %s1646_s8  ;;  %1204 = vrot.lane.b32.xlu1 %v1857_v47, %s1646_s8 }
 0x25d   :  { %1192 = vrot.lane.b32.xlu0 %v1727_v21, %s1646_s8 }
 0x25e   :  { %v2783_v62 = vpop.permute.xlu2 %1036  ;;  %v969_v56 = vpop.permute.xlu1 %968 }
 0x25f   :  { %v967_v11 = vpop.permute.xlu0 %966  ;;  %v991_v9 = vrot.slane %v969_v56, 1  ;;  %v1065_v15 = vrot.slane %v2783_v62, 2 }
 0x260   :  { %v990_v0 = vrot.slane %v967_v11, 1 }
 0x261   :  { %v1003_v29 = vsel %vm287_vm0, %v991_v9, %v992_v42 }
 0x262   :  { %v1005_v32 = vsel %vm287_vm0, %v989_v40, %v990_v0  ;;  %v2791_v19 = vsel %vm287_vm0, %v990_v0, %v991_v9  ;;  %v2793_v47 = vadd.f32 %v1003_v29, %v937_v45 }
 0x263   :  { %v2796_v21 = vadd.f32 %v1005_v32, %v2695_v41 }
 0x264   :  { %1190 = vrot.lane.b32.xlu2 %v1681_v16, %s1646_s8  ;;  %1138 = vrot.lane.b32.xlu1 %v3207_v4, %s1645_s7 }
 0x265   :  { %1136 = vrot.lane.b32.xlu0 %v1735_v22, %s1645_s7 }
 0x266   :  { %v2804_v10 = vpop.permute.xlu2 %1042  ;;  %v975_v33 = vpop.permute.xlu1 %974 }
 0x267   :  { %v973_v61 = vpop.permute.xlu0 %972  ;;  %v994_v45 = vrot.slane %v975_v33, 1 }
 0x268   :  { %v993_v55 = vrot.slane %v973_v61, 1  ;;  %v1022_v61 = vadd.f32 %v2791_v19, %v2641_v25 }
 0x269   :  { %v1000_v41 = vsel %vm287_vm0, %v994_v45, %v995_v48 }
 0x26a   :  { %v1002_v16 = vsel %vm287_vm0, %v992_v42, %v993_v55  ;;  %v2813_v59 = vsel %vm287_vm0, %v993_v55, %v994_v45  ;;  %v2816_v14 = vadd.f32 %v1000_v41, %v2715_v44 }
 0x26b   :  { %v2819_v43 = vadd.f32 %v1002_v16, %v2705_v60 }
 0x26c   :  { %1140 = vrot.lane.b32.xlu2 %v3220_v35, %s1645_s7  ;;  %1210 = vrot.lane.b32.xlu1 %v3197_v39, %s1646_s8 }
 0x26d   :  { %1208 = vrot.lane.b32.xlu0 %v1743_v23, %s1646_s8 }
 0x26e   :  { %v2827_v17 = vpop.permute.xlu2 %1048  ;;  %v981_v30 = vpop.permute.xlu1 %980 }
 0x26f   :  { %v979_v5 = vpop.permute.xlu0 %978  ;;  %v997_v53 = vrot.slane %v981_v30, 1 }
 0x270   :  { %v996_v36 = vrot.slane %v979_v5, 1 }
 0x271   :  { %v1013_v60 = vsel %vm287_vm0, %v997_v53, %v982_v7 }
 0x272   :  { %v999_v44 = vsel %vm287_vm0, %v995_v48, %v996_v36  ;;  %v2837_v39 = vsel %vm287_vm0, %v996_v36, %v997_v53  ;;  %v1029_v23 = vadd.f32 %v1013_v60, %v2725_v13  ;;  %v1062_v13 = vrot.slane %v2762_v50, 2 }
 0x273   :  { %v2841_v37 = vadd.f32 %v999_v44, %v2713_v31  ;;  %v1016_v31 = vadd.f32 %v2749_v20, %v2563_v51  ;;  %v1068_v50 = vrot.slane %v2804_v10, 2  ;;  %v1071_v10 = vrot.slane %v2827_v17, 2 }
 0x274   :  { %1216 = vrot.lane.b32.xlu2 %v1735_v22, %s1646_s8  ;;  %1214 = vrot.lane.b32.xlu1 %v1703_v18, %s1646_s8  ;;  %v1025_v36 = vadd.f32 %v2813_v59, %v2666_v52 }
 0x275   :  { %1212 = vrot.lane.b32.xlu0 %v1895_v57, %s1646_s8 }
 0x276   :  { %v2849_v27 = vpop.permute.xlu2 %1054  ;;  %v1035_v7 = vpop.permute.xlu1 %1034 }
 0x277   :  { %v1033_v8 = vpop.permute.xlu0 %1032  ;;  %v1064_v40 = vrot.slane %v1035_v7, 2  ;;  %v1074_v19 = vrot.slane %v2849_v27, 2 }
 0x278   :  { %v1063_v28 = vrot.slane %v1033_v8, 2 }
 0x279   :  { %v1090_v22 = vsel %vm368_vm1, %v1064_v40, %v1065_v15 }
 0x27a   :  { %v1092_v18 = vsel %vm368_vm1, %v1062_v13, %v1063_v28  ;;  %v1091_v57 = vsel %vm368_vm1, %v1063_v28, %v1064_v40  ;;  %v2861_v54 = vadd.f32 %v1090_v22, %v1016_v31  ;;  %v1028_v40 = vadd.f32 %v2837_v39, %v2681_v58 }
 0x27b   :  { %v2864_v38 = vadd.f32 %v1092_v18, %v2733_v49  ;;  %v2867_v63 = vadd.f32 %v1091_v57, %v2754_v12  ;;  %v1019_v49 = vadd.f32 %v2770_v1, %v2607_v34 }
 0x27c   :  { %1220 = vrot.lane.b32.xlu1 %v3220_v35, %s1646_s8 }
 0x27d   :  { %1218 = vrot.lane.b32.xlu0 %v3207_v4, %s1646_s8 }
 0x27e   :  { %v1061_v51 = vpop.permute.xlu2 %1060  ;;  %v1041_v20 = vpop.permute.xlu1 %1040 }
 0x27f   :  { %v1039_v6 = vpop.permute.xlu0 %1038  ;;  %v1077_v62 = vrot.slane %v1061_v51, 2  ;;  %v1067_v56 = vrot.slane %v1041_v20, 2 }
 0x280   :  { %v1066_v42 = vrot.slane %v1039_v6, 2 }
 0x281   :  { %v1093_v12 = vsel %vm368_vm1, %v1077_v62, %v1062_v13  ;;  %v1087_v35 = vsel %vm368_vm1, %v1067_v56, %v1068_v50 }
 0x282   :  { %v1089_v4 = vsel %vm368_vm1, %v1065_v15, %v1066_v42  ;;  %v2882_v11 = vadd.f32 %v1093_v12, %v1029_v23  ;;  %v1088_v9 = vsel %vm368_vm1, %v1066_v42, %v1067_v56  ;;  %v2886_v0 = vadd.f32 %v1087_v35, %v1019_v49 }
 0x283   :  { %v1097_v29 = vadd.f32 %v1089_v4, %v2751_v24  ;;  %v1098_v34 = vadd.f32 %v1088_v9, %v2775_v26 }
 0x286   :  { %v1115_v1 = vpop.permute.xlu2 %1114  ;;  %v1047_v32 = vpop.permute.xlu1 %1046 }
 0x287   :  { %v1045_v33 = vpop.permute.xlu0 %1044  ;;  %v1070_v48 = vrot.slane %v1047_v32, 2  ;;  %v1144_v39 = vrot.slane %v1115_v1, 3 }
 0x288   :  { %v1069_v45 = vrot.slane %v1045_v33, 2 }
 0x289   :  { %v1084_v55 = vsel %vm368_vm1, %v1070_v48, %v1071_v10 }
 0x28a   :  { %v1086_v41 = vsel %vm368_vm1, %v1068_v50, %v1069_v45  ;;  %v1085_v24 = vsel %vm368_vm1, %v1069_v45, %v1070_v48  ;;  %v2899_v26 = vadd.f32 %v1084_v55, %v1022_v61 }
 0x28b   :  { %v2902_v16 = vadd.f32 %v1086_v41, %v2772_v46  ;;  %v2905_v17 = vadd.f32 %v1085_v24, %v2796_v21 }
 0x28e   :  { %v2907_v30 = vpop.permute.xlu2 %1120  ;;  %v1053_v25 = vpop.permute.xlu1 %1052 }
 0x28f   :  { %v1051_v5 = vpop.permute.xlu0 %1050  ;;  %v1073_v53 = vrot.slane %v1053_v25, 2  ;;  %v1147_v42 = vrot.slane %v2907_v30, 3 }
 0x290   :  { %v1072_v60 = vrot.slane %v1051_v5, 2 }
 0x291   :  { %v1081_v44 = vsel %vm368_vm1, %v1073_v53, %v1074_v19 }
 0x292   :  { %v1083_v46 = vsel %vm368_vm1, %v1071_v10, %v1072_v60  ;;  %v1082_v21 = vsel %vm368_vm1, %v1072_v60, %v1073_v53  ;;  %v2918_v23 = vadd.f32 %v1081_v44, %v1025_v36 }
 0x293   :  { %v2921_v7 = vadd.f32 %v1083_v46, %v2793_v47  ;;  %v2924_v27 = vadd.f32 %v1082_v21, %v2819_v43 }
 0x296   :  { %v2926_v15 = vpop.permute.xlu2 %1126  ;;  %v1059_v52 = vpop.permute.xlu1 %1058 }
 0x297   :  { %v1057_v59 = vpop.permute.xlu0 %1056  ;;  %v1076_v8 = vrot.slane %v1059_v52, 2 }
 0x298   :  { %v1075_v31 = vrot.slane %v1057_v59, 2 }
 0x299   :  { %v1078_v13 = vsel %vm368_vm1, %v1076_v8, %v1077_v62 }
 0x29a   :  { %v1080_v28 = vsel %vm368_vm1, %v1074_v19, %v1075_v31  ;;  %v1079_v47 = vsel %vm368_vm1, %v1075_v31, %v1076_v8  ;;  %v2936_v43 = vadd.f32 %v1078_v13, %v1028_v40 }
 0x29b   :  { %v2939_v22 = vadd.f32 %v1080_v28, %v2816_v14  ;;  %v2942_v18 = vadd.f32 %v1079_v47, %v2841_v37 }
 0x29e   :  { %v2944_v57 = vpop.permute.xlu2 %1128  ;;  %v1113_v58 = vpop.permute.xlu1 %1112 }
 0x29f   :  { %v1111_v51 = vpop.permute.xlu0 %1110  ;;  %v1143_v20 = vrot.slane %v1113_v58, 3 }
 0x2a0   :  { %v1142_v50 = vrot.slane %v1111_v51, 3 }
 0x2a1   :  { %v1171_v6 = vsel %vm767_vm10, %v1143_v20, %v1144_v39 }
 0x2a2   :  { %v1172_v62 = vsel %vm767_vm10, %v1142_v50, %v1143_v20  ;;  %v2951_v56 = vadd.f32 %v1171_v6, %v2867_v63 }
 0x2a3   :  { %v2954_v14 = vadd.f32 %v1172_v62, %v2864_v38 }
 0x2a6   :  { %v1201_v37 = vpop.permute.xlu2 %1200  ;;  %v1119_v49 = vpop.permute.xlu1 %1118 }
 0x2a7   :  { %v1117_v12 = vpop.permute.xlu0 %1116  ;;  %v1146_v35 = vrot.slane %v1119_v49, 3  ;;  %v1227_v40 = vrot.slane %v1201_v37, 4  ;;  %v1150_v37 = vrot.slane %v2926_v15, 3 }
 0x2a8   :  { %v1145_v4 = vrot.slane %v1117_v12, 3 }
 0x2a9   :  { %v1168_v9 = vsel %vm767_vm10, %v1146_v35, %v1147_v42 }
 0x2aa   :  { %v1170_v1 = vsel %vm767_vm10, %v1144_v39, %v1145_v4  ;;  %v1169_v63 = vsel %vm767_vm10, %v1145_v4, %v1146_v35  ;;  %v1178_v32 = vadd.f32 %v1168_v9, %v1098_v34 }
 0x2ab   :  { %v1176_v38 = vadd.f32 %v1170_v1, %v2861_v54  ;;  %v1177_v10 = vadd.f32 %v1169_v63, %v1097_v29 }
 0x2ae   :  { %v2964_v33 = vpop.permute.xlu2 %1134  ;;  %v1125_v48 = vpop.permute.xlu1 %1124 }
 0x2af   :  { %v1123_v61 = vpop.permute.xlu0 %1122  ;;  %v1149_v28 = vrot.slane %v1125_v48, 3 }
 0x2b0   :  { %v1148_v36 = vrot.slane %v1123_v61, 3 }
 0x2b2   :  { %v1167_v21 = vsel %vm767_vm10, %v1147_v42, %v1148_v36 }
 0x2b3   :  { %v1179_v58 = vadd.f32 %v1167_v21, %v2886_v0  ;;  %v1165_v0 = vsel %vm767_vm10, %v1149_v28, %v1150_v37 }
 0x2b4   :  { %v1181_v15 = vadd.f32 %v1165_v0, %v2905_v17 }
 0x2b6   :  { %v2966_v45 = vpop.permute.xlu2 %1206  ;;  %v1199_v55 = vpop.permute.xlu1 %1198 }
 0x2b7   :  { %v1197_v41 = vpop.permute.xlu0 %1196  ;;  %v1226_v30 = vrot.slane %v1199_v55, 4  ;;  %v1230_v1 = vrot.slane %v2966_v45, 4 }
 0x2b8   :  { %v1225_v24 = vrot.slane %v1197_v41, 4 }
 0x2b9   :  { %v1249_v39 = vsel %vm1238_vm12, %v1226_v30, %v1227_v40 }
 0x2ba   :  { %v1250_v25 = vsel %vm1238_vm12, %v1225_v24, %v1226_v30  ;;  %v1259_v42 = vadd.f32 %v1249_v39, %v1178_v32 }
 0x2bb   :  { %v1258_v54 = vadd.f32 %v1250_v25, %v1177_v10 }
 0x2bd   :  { %v1276_v44 = vsel %vm1272_vm13, %v1258_v54, -inf }
 0x2be   :  { %v2971_v19 = vpop.permute.xlu2 %1190  ;;  %v1195_v34 = vpop.permute.xlu1 %1194 }
 0x2bf   :  { %v2973_v29 = vpop.permute.xlu0 %1130  ;;  %v1224_v5 = vrot.slane %v1195_v34, 4  ;;  %v1222_v32 = vrot.slane %v2971_v19, 4 }
 0x2c1   :  { %v1251_v53 = vsel %vm1238_vm12, %v1224_v5, %v1225_v24 }
 0x2c2   :  { %v1257_v60 = vadd.f32 %v1251_v53, %v1176_v38 }
 0x2c4   :  { %v1296_v46 = vmax.f32 %v1257_v60, %v1276_v44 }
 0x2c6   :  { %v1297_v52 = vrot.slane %v1296_v46, 4  ;;  %v2982_v59 = vpop.permute.xlu2 %1140  ;;  %v2984_v8 = vpop.permute.xlu1 %1132 }
 0x2c7   :  { %v1203_v31 = vpop.permute.xlu0 %1202  ;;  %v1157_v13 = vrot.slane %v2982_v59, 3 }
 0x2c8   :  { %v1228_v47 = vrot.slane %v1203_v31, 4  ;;  %v1298_v51 = vmax.f32 %v1296_v46, %v1297_v52  ;;  %v3030_v31 = vld [vmem:[#allocation7 + $0x2] ss:$0 sm:$0xff] }
 0x2c9   :  { %v1173_v20 = vsel %vm767_vm10, %v1157_v13, %v1142_v50  ;;  %v1166_v50 = vsel %vm767_vm10, %v1148_v36, %v1149_v28 }
 0x2ca   :  { %v1248_v6 = vsel %vm1238_vm12, %v1227_v40, %v1228_v47  ;;  %v2997_v62 = vadd.f32 %v1173_v20, %v2882_v11  ;;  %v1299_v12 = vrot.slane %v1298_v51, 2  ;;  %v1180_v48 = vadd.f32 %v1166_v50, %v2902_v16 }
 0x2cb   :  { %v1260_v49 = vadd.f32 %v1248_v6, %v1179_v58  ;;  %v1152_v58 = vrot.slane %v2973_v29, 3 }
 0x2cc   :  { %v1300_v61 = vmax.f32 %v1298_v51, %v1299_v12 }
 0x2cd   :  { %v1278_v35 = vsel %vm1272_vm13, %v1260_v49, -inf }
 0x2ce   :  { %v1303_v4 = vmax.f32 %v1259_v42, %v1278_v35  ;;  %v1205_v9 = vpop.permute.xlu1 %1204  ;;  %v1301_v53 = vrot.slane %v1300_v61, 1 }
 0x2cf   :  { %v1193_v11 = vpop.permute.xlu0 %1192  ;;  %v1229_v63 = vrot.slane %v1205_v9, 4 }
 0x2d0   :  { %v1304_v38 = vrot.slane %v1303_v4, 4  ;;  %v1223_v10 = vrot.slane %v1193_v11, 4  ;;  %v1302_v28 = vmax.f32 %v1300_v61, %v1301_v53 }
 0x2d1   :  { %v1246_v55 = vsel %vm1238_vm12, %v1229_v63, %v1230_v1  ;;  %v1247_v41 = vsel %vm1238_vm12, %v1228_v47, %v1229_v63  ;;  %v1151_v47 = vrot.slane %v2944_v57, 3 }
 0x2d2   :  { %v1305_v24 = vmax.f32 %v1303_v4, %v1304_v38  ;;  %v1252_v45 = vsel %vm1238_vm12, %v1223_v10, %v1224_v5  ;;  %v1253_v17 = vsel %vm1238_vm12, %v1222_v32, %v1223_v10  ;;  %v1261_v25 = vadd.f32 %v1247_v41, %v1180_v48 }
 0x2d3   :  { %v1255_v30 = vadd.f32 %v1253_v17, %v2954_v14  ;;  %v1256_v16 = vadd.f32 %v1252_v45, %v2951_v56  ;;  %v1262_v34 = vadd.f32 %v1246_v55, %v1181_v15  ;;  %v1350_v42 = vadd.f32 %v3030_v31, %v1302_v28 }
 0x2d4   :  { %v1306_v54 = vrot.slane %v1305_v24, 2  ;;  %v1164_v0 = vsel %vm767_vm10, %v1150_v37, %v1151_v47  ;;  %v1163_v12 = vsel %vm767_vm10, %v1151_v47, %v1152_v58  ;;  %v1153_v37 = vrot.slane %v2984_v8, 3 }
 0x2d5   :  { %v1274_v36 = vsel %vm1272_vm13, %v1256_v16, -inf  ;;  %v1280_v60 = vsel %vm1272_vm13, %v1262_v34, -inf  ;;  %v1182_v38 = vadd.f32 %v1164_v0, %v2899_v26  ;;  %v1183_v10 = vadd.f32 %v1163_v12, %v2921_v7 }
 0x2d6   :  { %v1307_v5 = vmax.f32 %v1305_v24, %v1306_v54  ;;  %v1289_v44 = vmax.f32 %v1255_v30, %v1274_v36  ;;  %v1310_v46 = vmax.f32 %v1261_v25, %v1280_v60  ;;  %v3026_v21 = vpop.permute.xlu1 %1138  ;;  %v1358_v48 = vmax.f32 %v1350_v42, 0.0 }
 0x2d7   :  { %v3028_v52 = vpop.permute.xlu0 %1136  ;;  %v1154_v45 = vrot.slane %v2964_v33, 3  ;;  %v1162_v25 = vsel %vm767_vm10, %v1152_v58, %v1153_v37 }
 0x2d8   :  { %v1308_v14 = vrot.slane %v1307_v5, 1  ;;  %v1290_v40 = vrot.slane %v1289_v44, 4  ;;  %v1311_v56 = vrot.slane %v1310_v46, 4  ;;  %v1373_v34 = vrot.slane %v1358_v48, 7 }
 0x2d9   :  { %v1161_v8 = vsel %vm767_vm10, %v1153_v37, %v1154_v45  ;;  %v1184_v28 = vadd.f32 %v1162_v25, %v2924_v27  ;;  %v1155_v58 = vrot.slane %v3028_v52, 3  ;;  %v1217_v27 = vpop.permute.xlu2 %1216 }
 0x2da   :  { %v1291_v39 = vmax.f32 %v1289_v44, %v1290_v40  ;;  %v1312_v51 = vmax.f32 %v1310_v46, %v1311_v56  ;;  %v1309_v20 = vmax.f32 %v1307_v5, %v1308_v14  ;;  %v1185_v47 = vadd.f32 %v1161_v8, %v2918_v23 }
 0x2db   :  { %v1160_v23 = vsel %vm767_vm10, %v1154_v45, %v1155_v58 }
 0x2dc   :  { %v1292_v6 = vrot.slane %v1291_v39, 2  ;;  %v1313_v49 = vrot.slane %v1312_v51, 2  ;;  %v1351_v57 = vadd.f32 %v3030_v31, %v1309_v20 }
 0x2de   :  { %v1293_v35 = vmax.f32 %v1291_v39, %v1292_v6  ;;  %v1314_v50 = vmax.f32 %v1312_v51, %v1313_v49  ;;  %v1211_v4 = vpop.permute.xlu1 %1210  ;;  %v1359_v17 = vmax.f32 %v1351_v57, 0.0  ;;  %v1156_v51 = vrot.slane %v3026_v21, 3 }
 0x2df   :  { %v1209_v9 = vpop.permute.xlu0 %1208  ;;  %v1232_v29 = vrot.slane %v1211_v4, 4 }
 0x2e0   :  { %v1294_v11 = vrot.slane %v1293_v35, 1  ;;  %v1315_v63 = vrot.slane %v1314_v50, 1  ;;  %v1231_v15 = vrot.slane %v1209_v9, 4  ;;  %v1375_v60 = vrot.slane %v1359_v17, 6 }
 0x2e1   :  { %v1158_v21 = vsel %vm767_vm10, %v1156_v51, %v1157_v13 }
 0x2e2   :  { %v1295_v61 = vmax.f32 %v1293_v35, %v1294_v11  ;;  %v1316_v55 = vmax.f32 %v1314_v50, %v1315_v63  ;;  %v1245_v41 = vsel %vm1238_vm12, %v1230_v1, %v1231_v15  ;;  %v1244_v24 = vsel %vm1238_vm12, %v1231_v15, %v1232_v29 }
 0x2e3   :  { %v1263_v30 = vadd.f32 %v1245_v41, %v1182_v38  ;;  %v1264_v16 = vadd.f32 %v1244_v24, %v1183_v10  ;;  %v1159_v50 = vsel %vm767_vm10, %v1155_v58, %v1156_v51  ;;  %v1186_v15 = vadd.f32 %v1160_v23, %v2939_v22 }
 0x2e4   :  { %v1349_v26 = vadd.f32 %v3030_v31, %v1295_v61  ;;  %v1352_v7 = vadd.f32 %v3030_v31, %v1316_v55  ;;  %v1187_v37 = vadd.f32 %v1159_v50, %v2942_v18  ;;  %v1188_v59 = vadd.f32 %v1158_v21, %v2936_v43 }
 0x2e5   :  { %v1282_v1 = vsel %vm1272_vm13, %v1264_v16, -inf }
 0x2e6   :  { %v1357_v54 = vmax.f32 %v1349_v26, 0.0  ;;  %v1360_v53 = vmax.f32 %v1352_v7, 0.0  ;;  %v1317_v33 = vmax.f32 %v1263_v30, %v1282_v1  ;;  %v1215_v36 = vpop.permute.xlu1 %1214 }
 0x2e7   :  { %v1213_v5 = vpop.permute.xlu0 %1212  ;;  %v1234_v44 = vrot.slane %v1215_v36, 4 }
 0x2e8   :  { %v1374_v46 = vsel %vm505_vm3, %v1373_v34, %v1357_v54  ;;  %v1377_v14 = vrot.slane %v1360_v53, 5  ;;  %v1318_v40 = vrot.slane %v1317_v33, 4  ;;  %v1233_v56 = vrot.slane %v1213_v5, 4 }
 0x2e9   :  { %v1376_v39 = vsel %vm508_vm4, %v1375_v60, %v1374_v46 }
 0x2ea   :  { %v1319_v20 = vmax.f32 %v1317_v33, %v1318_v40  ;;  %v1243_v6 = vsel %vm1238_vm12, %v1232_v29, %v1233_v56  ;;  %v1242_v49 = vsel %vm1238_vm12, %v1233_v56, %v1234_v44  ;;  %v1378_v12 = vsel %vm511_vm5, %v1377_v14, %v1376_v39 }
 0x2eb   :  { %v1265_v42 = vadd.f32 %v1243_v6, %v1184_v28  ;;  %v1266_v0 = vadd.f32 %v1242_v49, %v1185_v47  ;;  %v1235_v29 = vrot.slane %v1217_v27, 4 }
 0x2ec   :  { %v1320_v35 = vrot.slane %v1319_v20, 2 }
 0x2ed   :  { %v1284_v52 = vsel %vm1272_vm13, %v1266_v0, -inf  ;;  %v1241_v13 = vsel %vm1238_vm12, %v1234_v44, %v1235_v29 }
 0x2ee   :  { %v1321_v4 = vmax.f32 %v1319_v20, %v1320_v35  ;;  %v1324_v57 = vmax.f32 %v1265_v42, %v1284_v52  ;;  %v1221_v9 = vpop.permute.xlu1 %1220  ;;  %v1267_v30 = vadd.f32 %v1241_v13, %v1186_v15 }
 0x2ef   :  { %v1219_v11 = vpop.permute.xlu0 %1218  ;;  %v1237_v63 = vrot.slane %v1221_v9, 4 }
 0x2f0   :  { %v1322_v38 = vrot.slane %v1321_v4, 1  ;;  %v1325_v10 = vrot.slane %v1324_v57, 4  ;;  %v1236_v48 = vrot.slane %v1219_v11, 4 }
 0x2f1   :  { %v1254_v61 = vsel %vm1238_vm12, %v1237_v63, %v1222_v32 }
 0x2f2   :  { %v1323_v55 = vmax.f32 %v1321_v4, %v1322_v38  ;;  %v1326_v41 = vmax.f32 %v1324_v57, %v1325_v10  ;;  %v1240_v22 = vsel %vm1238_vm12, %v1235_v29, %v1236_v48  ;;  %v1239_v24 = vsel %vm1238_vm12, %v1236_v48, %v1237_v63 }
 0x2f3   :  { %v1268_v45 = vadd.f32 %v1240_v22, %v1187_v37  ;;  %v1269_v18 = vadd.f32 %v1239_v24, %v1188_v59  ;;  %v1270_v43 = vadd.f32 %v1254_v61, %v2997_v62 }
 0x2f4   :  { %v1353_v17 = vadd.f32 %v3030_v31, %v1323_v55  ;;  %v1327_v16 = vrot.slane %v1326_v41, 2 }
 0x2f5   :  { %v1286_v19 = vsel %vm1272_vm13, %v1268_v45, -inf  ;;  %v1288_v32 = vsel %vm1272_vm13, %v1270_v43, -inf }
 0x2f6   :  { %v1361_v26 = vmax.f32 %v1353_v17, 0.0  ;;  %v1328_v7 = vmax.f32 %v1326_v41, %v1327_v16  ;;  %v1331_v8 = vmax.f32 %v1267_v30, %v1286_v19  ;;  %v1338_v25 = vmax.f32 %v1269_v18, %v1288_v32 }
 0x2f8   :  { %v1379_v2 = vrot.slane %v1361_v26, 4  ;;  %v1329_v1 = vrot.slane %v1328_v7, 1  ;;  %v1332_v34 = vrot.slane %v1331_v8, 4  ;;  %v1339_v54 = vrot.slane %v1338_v25, 4 }
 0x2fa   :  { %v1330_v53 = vmax.f32 %v1328_v7, %v1329_v1  ;;  %v1333_v62 = vmax.f32 %v1331_v8, %v1332_v34  ;;  %v1340_v33 = vmax.f32 %v1338_v25, %v1339_v54  ;;  %v1380_v36 = vsel %vm514_vm6, %v1379_v2, %v1378_v12 }
 0x2fc   :  { %v1354_v60 = vadd.f32 %v3030_v31, %v1330_v53  ;;  %v1334_v5 = vrot.slane %v1333_v62, 2  ;;  %v1341_v44 = vrot.slane %v1340_v33, 2 }
 0x2fe   :  { %v1362_v46 = vmax.f32 %v1354_v60, 0.0  ;;  %v1335_v3 = vmax.f32 %v1333_v62, %v1334_v5  ;;  %v1342_v14 = vmax.f32 %v1340_v33, %v1341_v44 }
 0x300   :  { %v1381_v40 = vrot.slane %v1362_v46, 3  ;;  %v1336_v56 = vrot.slane %v1335_v3, 1  ;;  %v1343_v28 = vrot.slane %v1342_v14, 1 }
 0x302   :  { %v1337_v47 = vmax.f32 %v1335_v3, %v1336_v56  ;;  %v1344_v58 = vmax.f32 %v1342_v14, %v1343_v28  ;;  %v1382_v39 = vsel %vm517_vm7, %v1381_v40, %v1380_v36 }
 0x304   :  { %v1355_v51 = vadd.f32 %v3030_v31, %v1337_v47  ;;  %v1356_v20 = vadd.f32 %v3030_v31, %v1344_v58 }
 0x306   :  { %v1363_v6 = vmax.f32 %v1355_v51, 0.0  ;;  %v1364_v49 = vmax.f32 %v1356_v20, 0.0 }
 0x308   :  { %v1383_v42 = vrot.slane %v1363_v6, 2  ;;  %v1385_v0 = vrot.slane %v1364_v49, 1 }
 0x30a   :  { %v1384_v12 = vsel %vm520_vm8, %v1383_v42, %v1382_v39 }
 0x30b   :  { %v1386_v27 = vsel %vm523_vm9, %v1385_v0, %v1384_v12 }
 0x30c   :  { %1388 = vst [vmem:[#allocation8 + $0x10] sm:$0xff] %v1386_v27 }
 0x30d   :  { %1399 = dma.vmem_to_hbm [thread:$0]  %s1395_s10, 384, %s1397_s13, [#allocation4]  }
 0x30e   :  { %1630 = dma.done.wait [#allocation4], 384  }
 0x30f   :  { %1631 = vsyncadd [#allocation4], 4294966912 }
 0x310   :  { %1404 = vsyncpa [#allocation3], 1 }
 0x311   :  { %1405 = vsyncpa [#allocation6], 1 }
 0x312   :  { %1406 = vsyncpa [#allocation4], 1 }

</bundles_post_ra>
